<compile_context>
chip_gen: v6e
topology: v6e:2x2x1
jax: 0.10.0
libtpu: 0.0.40
codegen_flags: <defaults>
</compile_context>

<pallas_src>
import math
import functools

import jax
import jax.numpy as jnp
from jax.experimental import pallas as pl
from jax.experimental.pallas import tpu as pltpu


def _round_up(x, m):
    return (x + m - 1) // m * m


def _gelu_tanh(x):
    # TODO(synk): PyTorch nn.GELU() default is the exact erf form; the tanh
    # approximation used here differs by <~1e-3 but lowers cleanly on Mosaic.
    c = 0.7978845608028654  # sqrt(2/pi)
    return 0.5 * x * (1.0 + jnp.tanh(c * (x + 0.044715 * x * x * x)))


# ----------------------------------------------------------------------------
# Fused matmul kernel:  out = act(x @ W + b) [+ residual]
# ----------------------------------------------------------------------------
def _make_matmul_kernel(has_bias, has_residual, act):
    def kernel(*refs):
        x_ref, w_ref = refs[0], refs[1]
        i = 2
        b_ref = r_ref = None
        if has_bias:
            b_ref = refs[i]; i += 1
        if has_residual:
            r_ref = refs[i]; i += 1
        o_ref = refs[i]
        acc = jnp.dot(x_ref[...].astype(jnp.bfloat16),
                      w_ref[...].astype(jnp.bfloat16),
                      preferred_element_type=jnp.float32)
        if has_bias:
            acc = acc + b_ref[...].astype(jnp.float32)
        if act == "gelu":
            acc = _gelu_tanh(acc)
        if has_residual:
            acc = acc + r_ref[...].astype(jnp.float32)
        o_ref[...] = acc.astype(o_ref.dtype)
    return kernel


def pallas_matmul(x, w, b=None, *, act=None, residual=None,
                  out_dtype=jnp.float32):
    """out = act(x @ w + b) [+ residual];  x:(M,K), w:(K,N), b:(N,)."""
    M, K = x.shape
    K2, N = w.shape
    assert K == K2

    # M tiling (sublane): cap tiles at 256 rows so the activation block stays
    # small in VMEM; N padded to a lane-dense multiple of 128 (unmasked stores).
    tm = 256 if M >= 256 else _round_up(M, 8)
    M_pad = _round_up(M, tm)
    N_pad = _round_up(N, 128)
    tn = 256 if N_pad % 256 == 0 else 128

    if M_pad != M:
        x = jnp.pad(x, ((0, M_pad - M), (0, 0)))
    if N_pad != N:
        w = jnp.pad(w, ((0, 0), (0, N_pad - N)))

    in_specs = [pl.BlockSpec((tm, K), lambda i, j: (i, 0)),   # activations
                pl.BlockSpec((K, tn), lambda i, j: (0, j))]   # weights
    args = [x, w]
    if b is not None:
        bb = b.reshape(1, N).astype(jnp.float32)
        if N_pad != N:
            bb = jnp.pad(bb, ((0, 0), (0, N_pad - N)))
        in_specs.append(pl.BlockSpec((1, tn), lambda i, j: (0, j)))
        args.append(bb)
    if residual is not None:
        r = residual
        if M_pad != M or N_pad != N:
            r = jnp.pad(r, ((0, M_pad - M), (0, N_pad - N)))
        in_specs.append(pl.BlockSpec((tm, tn), lambda i, j: (i, j)))
        args.append(r)

    out = pl.pallas_call(
        _make_matmul_kernel(b is not None, residual is not None, act),
        out_shape=jax.ShapeDtypeStruct((M_pad, N_pad), out_dtype),
        grid_spec=pltpu.PrefetchScalarGridSpec(
            num_scalar_prefetch=0,
            grid=(M_pad // tm, N_pad // tn),
            in_specs=in_specs,
            out_specs=pl.BlockSpec((tm, tn), lambda i, j: (i, j))),
        compiler_params=pltpu.CompilerParams(
            dimension_semantics=("parallel", "parallel")),
    )(*args)
    return out[:M, :N]


# ----------------------------------------------------------------------------
# LayerNorm kernel (row-tiled, f32 statistics)
# ----------------------------------------------------------------------------
def _ln_kernel(x_ref, g_ref, b_ref, o_ref):
    x = x_ref[...].astype(jnp.float32)
    mean = jnp.mean(x, axis=-1, keepdims=True)
    xc = x - mean
    var = jnp.mean(xc * xc, axis=-1, keepdims=True)
    inv = jax.lax.rsqrt(var + 1e-5)
    y = xc * inv * g_ref[...].astype(jnp.float32) + b_ref[...].astype(jnp.float32)
    o_ref[...] = y.astype(o_ref.dtype)


def pallas_layernorm(x, g, b, out_dtype=jnp.bfloat16):
    orig_shape = x.shape
    C = orig_shape[-1]
    x2 = x.reshape(-1, C)
    M = x2.shape[0]
    tm = 256 if M >= 256 else _round_up(M, 8)
    M_pad = _round_up(M, tm)
    if M_pad != M:
        x2 = jnp.pad(x2, ((0, M_pad - M), (0, 0)))
    out = pl.pallas_call(
        _ln_kernel,
        out_shape=jax.ShapeDtypeStruct((M_pad, C), out_dtype),
        grid_spec=pltpu.PrefetchScalarGridSpec(
            num_scalar_prefetch=0,
            grid=(M_pad // tm,),
            in_specs=[pl.BlockSpec((tm, C), lambda i: (i, 0)),
                      pl.BlockSpec((1, C), lambda i: (0, 0)),
                      pl.BlockSpec((1, C), lambda i: (0, 0))],
            out_specs=pl.BlockSpec((tm, C), lambda i: (i, 0))),
        compiler_params=pltpu.CompilerParams(
            dimension_semantics=("parallel",)),
    )(x2, g.reshape(1, C), b.reshape(1, C))
    return out[:M].reshape(orig_shape)


# ----------------------------------------------------------------------------
# Cross-conditional causal self-attention kernel (per batch x head)
# ----------------------------------------------------------------------------
def _attn_kernel(q_ref, k_ref, v_ref, o_ref, *, t_seg, scale):
    q = q_ref[...].astype(jnp.bfloat16)            # (T, hd)
    k = k_ref[...].astype(jnp.bfloat16)
    v = v_ref[...].astype(jnp.bfloat16)
    T = q.shape[0]
    s = jax.lax.dot_general(q, k, (((1,), (1,)), ((), ())),
                            preferred_element_type=jnp.float32) * scale  # (T,T)
    # mask(i, j) = (j mod t) <= (i mod t)   (tril(t) tiled 3x3)
    row = jax.lax.broadcasted_iota(jnp.int32, (T, T), 0) % t_seg
    col = jax.lax.broadcasted_iota(jnp.int32, (T, T), 1) % t_seg
    s = jnp.where(col <= row, s, -1e30)
    s = s - jnp.max(s, axis=-1, keepdims=True)
    p = jnp.exp(s)
    p = p / jnp.sum(p, axis=-1, keepdims=True)
    y = jnp.dot(p.astype(jnp.bfloat16), v, preferred_element_type=jnp.float32)
    o_ref[...] = y.astype(o_ref.dtype)


def pallas_attention(q, k, v, t_seg):
    """q, k, v: (B, H, T, hd) -> (B, H, T, hd) bf16."""
    B, H, T, hd = q.shape
    scale = 1.0 / math.sqrt(hd)

    def spec():
        return pl.BlockSpec((pl.Squeezed(), pl.Squeezed(), T, hd),
                            lambda b, h: (b, h, 0, 0))

    return pl.pallas_call(
        functools.partial(_attn_kernel, t_seg=t_seg, scale=scale),
        out_shape=jax.ShapeDtypeStruct((B, H, T, hd), jnp.bfloat16),
        grid_spec=pltpu.PrefetchScalarGridSpec(
            num_scalar_prefetch=0,
            grid=(B, H),
            in_specs=[spec(), spec(), spec()],
            out_specs=spec()),
        compiler_params=pltpu.CompilerParams(
            dimension_semantics=("parallel", "parallel")),
    )(q, k, v)


# ----------------------------------------------------------------------------
# Parameter init (PyTorch _init_weights: Linear ~ N(0, 0.02), bias 0; LN 1/0)
# ----------------------------------------------------------------------------
def _linear_init(key, n_in, n_out, bias=True):
    w = (0.02 * jax.random.normal(key, (n_in, n_out), jnp.float32)
         ).astype(jnp.bfloat16)
    b = jnp.zeros((n_out,), jnp.float32) if bias else None
    return w, b


def init_gpt_head_params(key, *, n_layer, n_embd, n_head,
                         vocab_size_up, vocab_size_down):
    params = {"blocks": [], "n_head": n_head}
    for _ in range(n_layer):
        key, k_qkv, k_proj, k_fc1, k_fc2 = jax.random.split(key, 5)
        w_qkv, b_qkv = _linear_init(k_qkv, n_embd, 3 * n_embd)   # [q | k | v]
        w_proj, b_proj = _linear_init(k_proj, n_embd, n_embd)
        w_fc1, b_fc1 = _linear_init(k_fc1, n_embd, 4 * n_embd)
        w_fc2, b_fc2 = _linear_init(k_fc2, 4 * n_embd, n_embd)
        params["blocks"].append({
            "ln1_g": jnp.ones((n_embd,), jnp.float32),
            "ln1_b": jnp.zeros((n_embd,), jnp.float32),
            "ln2_g": jnp.ones((n_embd,), jnp.float32),
            "ln2_b": jnp.zeros((n_embd,), jnp.float32),
            "w_qkv": w_qkv, "b_qkv": b_qkv,
            "w_proj": w_proj, "b_proj": b_proj,
            "w_fc1": w_fc1, "b_fc1": b_fc1,
            "w_fc2": w_fc2, "b_fc2": b_fc2,
        })
    key, k_up, k_down = jax.random.split(key, 3)
    params["ln_f_g"] = jnp.ones((n_embd,), jnp.float32)
    params["ln_f_b"] = jnp.zeros((n_embd,), jnp.float32)
    params["w_up"], _ = _linear_init(k_up, n_embd, vocab_size_up, bias=False)
    params["w_down"], _ = _linear_init(k_down, n_embd, vocab_size_down, bias=False)
    return params


# ----------------------------------------------------------------------------
# Forward pass
# ----------------------------------------------------------------------------
def _block_forward(p, x, n_head):
    B, T, C = x.shape
    hd = C // n_head
    x2 = x.reshape(B * T, C)

    # attention branch: x = x + proj(attn(ln1(x)))
    h = pallas_layernorm(x, p["ln1_g"], p["ln1_b"])                    # bf16
    qkv = pallas_matmul(h.reshape(B * T, C), p["w_qkv"], p["b_qkv"],
                        out_dtype=jnp.bfloat16)                        # (B*T,3C)
    qkv = qkv.reshape(B, T, 3, n_head, hd)
    qkv = jnp.transpose(qkv, (2, 0, 3, 1, 4))                          # (3,B,H,T,hd)
    q, k, v = qkv[0], qkv[1], qkv[2]
    y = pallas_attention(q, k, v, t_seg=T // 3)                        # (B,H,T,hd)
    y = jnp.transpose(y, (0, 2, 1, 3)).reshape(B * T, C)
    x2 = pallas_matmul(y, p["w_proj"], p["b_proj"], residual=x2,
                       out_dtype=jnp.float32)                          # f32

    # MLP branch: x = x + fc2(gelu(fc1(ln2(x))))
    h2 = pallas_layernorm(x2.reshape(B, T, C), p["ln2_g"], p["ln2_b"])
    m = pallas_matmul(h2.reshape(B * T, C), p["w_fc1"], p["b_fc1"],
                      act="gelu", out_dtype=jnp.bfloat16)              # (B*T,4C)
    x2 = pallas_matmul(m, p["w_fc2"], p["b_fc2"], residual=x2,
                       out_dtype=jnp.float32)
    return x2.reshape(B, T, C)


def gpt_head_forward(params, x):
    """x: (B, T=3*t, C) -> (logits_up (B,t,V_up), logits_down (B,t,V_down))."""
    B, T, C = x.shape
    assert T % 3 == 0
    x = x.astype(jnp.float32)
    for p in params["blocks"]:
        x = _block_forward(p, x, params["n_head"])
    h = pallas_layernorm(x, params["ln_f_g"], params["ln_f_b"])
    t = T // 3
    V_up = params["w_up"].shape[1]
    V_down = params["w_down"].shape[1]
    up_in = h[:, t:2 * t, :].reshape(B * t, C)
    down_in = h[:, 2 * t:3 * t, :].reshape(B * t, C)
    logits_up = pallas_matmul(up_in, params["w_up"], None,
                              out_dtype=jnp.float32).reshape(B, t, V_up)
    logits_down = pallas_matmul(down_in, params["w_down"], None,
                                out_dtype=jnp.float32).reshape(B, t, V_down)
    return logits_up, logits_down


if __name__ == "__main__":
    key = jax.random.PRNGKey(0)
    kp, kx = jax.random.split(key)

    # Small but TPU-friendly config: n_embd % n_head == 0, T = 3*t.
    n_layer, n_embd, n_head = 2, 128, 4
    t = 8
    T = 3 * t
    B = 2
    vocab_size_up, vocab_size_down = 96, 72   # exercise lane-padding path

    params = init_gpt_head_params(
        kp, n_layer=n_layer, n_embd=n_embd, n_head=n_head,
        vocab_size_up=vocab_size_up, vocab_size_down=vocab_size_down)
    x = jax.random.normal(kx, (B, T, n_embd), jnp.float32)

    fwd = jax.jit(functools.partial(gpt_head_forward, params))
    logits_up, logits_down = fwd(x)
    jax.block_until_ready((logits_up, logits_down))

    assert logits_up.shape == (B, t, vocab_size_up), logits_up.shape
    assert logits_down.shape == (B, t, vocab_size_down), logits_down.shape
    assert bool(jnp.all(jnp.isfinite(logits_up)))
    assert bool(jnp.all(jnp.isfinite(logits_down)))
    print("KERNEL_OK")
</pallas_src>

<mosaic_0001>
module attributes {stable_mosaic.version = 11 : i64} {
  func.func @_ln_kernel(%arg0: i32, %arg1: memref<48x128xf32, #tpu.memory_space<vmem>>, %arg2: memref<1x128xf32, #tpu.memory_space<vmem>>, %arg3: memref<1x128xf32, #tpu.memory_space<vmem>>, %arg4: memref<48x128xbf16, #tpu.memory_space<vmem>>) attributes {dimension_semantics = [#tpu.dimension_semantics<parallel>], iteration_bounds = array<i64: 1>, scalar_prefetch = 0 : i64, scratch_operands = 0 : i64, tpu.core_type = #tpu.core_type<tc>, window_params = [{transform_indices = @transform_0, window_bounds = array<i64: 48, 128>}, {pipeline_mode = #tpu.pipeline_mode<synchronous>, transform_indices = @transform_1, window_bounds = array<i64: 1, 128>}, {pipeline_mode = #tpu.pipeline_mode<synchronous>, transform_indices = @transform_2, window_bounds = array<i64: 1, 128>}, {transform_indices = @transform_3, window_bounds = array<i64: 48, 128>}]} {
    %c0 = arith.constant 0 : index
    %c0_0 = arith.constant 0 : index
    %0 = vector.load %arg1[%c0, %c0_0] : memref<48x128xf32, #tpu.memory_space<vmem>>, vector<48x128xf32>
    %cst = arith.constant dense<0.000000e+00> : vector<48xf32>
    %1 = vector.multi_reduction <add>, %0, %cst [1] : vector<48x128xf32> to vector<48xf32>
    %2 = vector.shape_cast %1 : vector<48xf32> to vector<48x1xf32>
    %cst_1 = arith.constant 1.280000e+02 : f32
    %3 = vector.broadcast %cst_1 : f32 to vector<48x1xf32>
    %4 = arith.divf %2, %3 : vector<48x1xf32>
    %5 = vector.broadcast %4 : vector<48x1xf32> to vector<48x128xf32>
    %6 = arith.subf %0, %5 : vector<48x128xf32>
    %7 = arith.mulf %6, %6 : vector<48x128xf32>
    %cst_2 = arith.constant dense<0.000000e+00> : vector<48xf32>
    %8 = vector.multi_reduction <add>, %7, %cst_2 [1] : vector<48x128xf32> to vector<48xf32>
    %9 = vector.shape_cast %8 : vector<48xf32> to vector<48x1xf32>
    %cst_3 = arith.constant 1.280000e+02 : f32
    %10 = vector.broadcast %cst_3 : f32 to vector<48x1xf32>
    %11 = arith.divf %9, %10 : vector<48x1xf32>
    %cst_4 = arith.constant 9.99999974E-6 : f32
    %12 = vector.broadcast %cst_4 : f32 to vector<48x1xf32>
    %13 = arith.addf %11, %12 : vector<48x1xf32>
    %14 = math.rsqrt %13 : vector<48x1xf32>
    %15 = vector.broadcast %14 : vector<48x1xf32> to vector<48x128xf32>
    %16 = arith.mulf %6, %15 : vector<48x128xf32>
    %c0_5 = arith.constant 0 : index
    %c0_6 = arith.constant 0 : index
    %17 = vector.load %arg2[%c0_5, %c0_6] : memref<1x128xf32, #tpu.memory_space<vmem>>, vector<1x128xf32>
    %18 = vector.broadcast %17 : vector<1x128xf32> to vector<48x128xf32>
    %19 = arith.mulf %16, %18 : vector<48x128xf32>
    %c0_7 = arith.constant 0 : index
    %c0_8 = arith.constant 0 : index
    %20 = vector.load %arg3[%c0_7, %c0_8] : memref<1x128xf32, #tpu.memory_space<vmem>>, vector<1x128xf32>
    %21 = vector.broadcast %20 : vector<1x128xf32> to vector<48x128xf32>
    %22 = arith.addf %19, %21 : vector<48x128xf32>
    %23 = arith.truncf %22 : vector<48x128xf32> to vector<48x128xbf16>
    %c0_9 = arith.constant 0 : index
    %c0_10 = arith.constant 0 : index
    %24 = vector.load %arg4[%c0_9, %c0_10] : memref<48x128xbf16, #tpu.memory_space<vmem>>, vector<48x128xbf16>
    tpu.vector_store %arg4[%c0_9, %c0_10], %23 {strides = array<i32>} : memref<48x128xbf16, #tpu.memory_space<vmem>>, vector<48x128xbf16>,
    return
  }
  func.func @transform_0(%arg0: i32) -> (i32, i32) {
    %c0_i32 = arith.constant 0 : i32
    %c0_i32_0 = arith.constant 0 : i32
    return %arg0, %c0_i32 : i32, i32
  }
  func.func @transform_1(%arg0: i32) -> (i32, i32) {
    %c0_i32 = arith.constant 0 : i32
    %c0_i32_0 = arith.constant 0 : i32
    %c0_i32_1 = arith.constant 0 : i32
    return %c0_i32, %c0_i32_0 : i32, i32
  }
  func.func @transform_2(%arg0: i32) -> (i32, i32) {
    %c0_i32 = arith.constant 0 : i32
    %c0_i32_0 = arith.constant 0 : i32
    %c0_i32_1 = arith.constant 0 : i32
    return %c0_i32, %c0_i32_0 : i32, i32
  }
  func.func @transform_3(%arg0: i32) -> (i32, i32) {
    %c0_i32 = arith.constant 0 : i32
    %c0_i32_0 = arith.constant 0 : i32
    return %arg0, %c0_i32 : i32, i32
  }
}

module attributes {stable_mosaic.version = 11 : i64} {
  func.func @kernel(%arg0: i32, %arg1: i32, %arg2: memref<48x128xbf16, #tpu.memory_space<vmem>>, %arg3: memref<128x128xbf16, #tpu.memory_space<vmem>>, %arg4: memref<1x128xf32, #tpu.memory_space<vmem>>, %arg5: memref<48x128xbf16, #tpu.memory_space<vmem>>) attributes {dimension_semantics = [#tpu.dimension_semantics<parallel>, #tpu.dimension_semantics<parallel>], iteration_bounds = array<i64: 1, 3>, scalar_prefetch = 0 : i64, scratch_operands = 0 : i64, tpu.core_type = #tpu.core_type<tc>, window_params = [{transform_indices = @transform_0, window_bounds = array<i64: 48, 128>}, {transform_indices = @transform_1, window_bounds = array<i64: 128, 128>}, {transform_indices = @transform_2, window_bounds = array<i64: 1, 128>}, {transform_indices = @transform_3, window_bounds = array<i64: 48, 128>}]} {
    %c0 = arith.constant 0 : index
    %c0_0 = arith.constant 0 : index
    %0 = vector.load %arg2[%c0, %c0_0] : memref<48x128xbf16, #tpu.memory_space<vmem>>, vector<48x128xbf16>
    %c0_1 = arith.constant 0 : index
    %c0_2 = arith.constant 0 : index
    %1 = vector.load %arg3[%c0_1, %c0_2] : memref<128x128xbf16, #tpu.memory_space<vmem>>, vector<128x128xbf16>
    %cst = arith.constant dense<0.000000e+00> : vector<48x128xf32>
    %2 = tpu.matmul %0, %1, %cst {dimension_numbers = #tpu.dot_dimension_numbers<[1], [0], [0], [1], [0, 0, 1, 1], [], []>} : vector<48x128xbf16>, vector<128x128xbf16>, vector<48x128xf32> -> vector<48x128xf32>
    %c0_3 = arith.constant 0 : index
    %c0_4 = arith.constant 0 : index
    %3 = vector.load %arg4[%c0_3, %c0_4] : memref<1x128xf32, #tpu.memory_space<vmem>>, vector<1x128xf32>
    %4 = vector.broadcast %3 : vector<1x128xf32> to vector<48x128xf32>
    %5 = arith.addf %2, %4 : vector<48x128xf32>
    %6 = arith.truncf %5 : vector<48x128xf32> to vector<48x128xbf16>
    %c0_5 = arith.constant 0 : index
    %c0_6 = arith.constant 0 : index
    %7 = vector.load %arg5[%c0_5, %c0_6] : memref<48x128xbf16, #tpu.memory_space<vmem>>, vector<48x128xbf16>
    tpu.vector_store %arg5[%c0_5, %c0_6], %6 {strides = array<i32>} : memref<48x128xbf16, #tpu.memory_space<vmem>>, vector<48x128xbf16>,
    return
  }
  func.func @transform_0(%arg0: i32, %arg1: i32) -> (i32, i32) {
    %c0_i32 = arith.constant 0 : i32
    %c0_i32_0 = arith.constant 0 : i32
    return %arg0, %c0_i32 : i32, i32
  }
  func.func @transform_1(%arg0: i32, %arg1: i32) -> (i32, i32) {
    %c0_i32 = arith.constant 0 : i32
    %c0_i32_0 = arith.constant 0 : i32
    return %c0_i32, %arg1 : i32, i32
  }
  func.func @transform_2(%arg0: i32, %arg1: i32) -> (i32, i32) {
    %c0_i32 = arith.constant 0 : i32
    %c0_i32_0 = arith.constant 0 : i32
    return %c0_i32, %arg1 : i32, i32
  }
  func.func @transform_3(%arg0: i32, %arg1: i32) -> (i32, i32) {
    %c0_i32 = arith.constant 0 : i32
    return %arg0, %arg1 : i32, i32
  }
}

module attributes {stable_mosaic.version = 11 : i64} {
  func.func @_attn_kernel(%arg0: i32, %arg1: i32, %arg2: memref<1x1x24x32xbf16, #tpu.memory_space<vmem>>, %arg3: memref<1x1x24x32xbf16, #tpu.memory_space<vmem>>, %arg4: memref<1x1x24x32xbf16, #tpu.memory_space<vmem>>, %arg5: memref<1x1x24x32xbf16, #tpu.memory_space<vmem>>) attributes {dimension_semantics = [#tpu.dimension_semantics<parallel>, #tpu.dimension_semantics<parallel>], iteration_bounds = array<i64: 2, 4>, scalar_prefetch = 0 : i64, scratch_operands = 0 : i64, tpu.core_type = #tpu.core_type<tc>, window_params = [{transform_indices = @transform_0, window_bounds = array<i64: 1, 1, 24, 32>}, {transform_indices = @transform_1, window_bounds = array<i64: 1, 1, 24, 32>}, {transform_indices = @transform_2, window_bounds = array<i64: 1, 1, 24, 32>}, {transform_indices = @transform_3, window_bounds = array<i64: 1, 1, 24, 32>}]} {
    %c0 = arith.constant 0 : index
    %c0_0 = arith.constant 0 : index
    %c0_1 = arith.constant 0 : index
    %c0_2 = arith.constant 0 : index
    %0 = vector.load %arg2[%c0, %c0_0, %c0_1, %c0_2] : memref<1x1x24x32xbf16, #tpu.memory_space<vmem>>, vector<1x1x24x32xbf16>
    %1 = vector.shape_cast %0 : vector<1x1x24x32xbf16> to vector<24x32xbf16>
    %c0_3 = arith.constant 0 : index
    %c0_4 = arith.constant 0 : index
    %c0_5 = arith.constant 0 : index
    %c0_6 = arith.constant 0 : index
    %2 = vector.load %arg3[%c0_3, %c0_4, %c0_5, %c0_6] : memref<1x1x24x32xbf16, #tpu.memory_space<vmem>>, vector<1x1x24x32xbf16>
    %3 = vector.shape_cast %2 : vector<1x1x24x32xbf16> to vector<24x32xbf16>
    %c0_7 = arith.constant 0 : index
    %c0_8 = arith.constant 0 : index
    %c0_9 = arith.constant 0 : index
    %c0_10 = arith.constant 0 : index
    %4 = vector.load %arg4[%c0_7, %c0_8, %c0_9, %c0_10] : memref<1x1x24x32xbf16, #tpu.memory_space<vmem>>, vector<1x1x24x32xbf16>
    %5 = vector.shape_cast %4 : vector<1x1x24x32xbf16> to vector<24x32xbf16>
    %cst = arith.constant dense<0.000000e+00> : vector<24x24xf32>
    %6 = tpu.matmul %1, %3, %cst {dimension_numbers = #tpu.dot_dimension_numbers<[1], [1], [0], [0], [0, 0, 1, 0], [], []>} : vector<24x32xbf16>, vector<24x32xbf16>, vector<24x24xf32> -> vector<24x24xf32>
    %cst_11 = arith.constant 0.176776692 : f32
    %7 = vector.broadcast %cst_11 : f32 to vector<24x24xf32>
    %8 = arith.mulf %6, %7 : vector<24x24xf32>
    %9 = tpu.iota {dimensions = array<i32: 0>} : vector<24x24xi32>
    %c8_i32 = arith.constant 8 : i32
    %c0_i32 = arith.constant 0 : i32
    %10 = arith.cmpi eq, %c8_i32, %c0_i32 : i32
    %c1_i32 = arith.constant 1 : i32
    %11 = arith.select %10, %c1_i32, %c8_i32 : i32
    %12 = vector.broadcast %11 : i32 to vector<24x24xi32>
    %13 = arith.remsi %9, %12 : vector<24x24xi32>
    %c0_i32_12 = arith.constant 0 : i32
    %14 = vector.broadcast %c0_i32_12 : i32 to vector<24x24xi32>
    %15 = arith.cmpi ne, %13, %14 : vector<24x24xi32>
    %c0_i32_13 = arith.constant 0 : i32
    %16 = vector.broadcast %c0_i32_13 : i32 to vector<24x24xi32>
    %17 = arith.cmpi slt, %13, %16 : vector<24x24xi32>
    %c0_i32_14 = arith.constant 0 : i32
    %18 = arith.cmpi slt, %11, %c0_i32_14 : i32
    %19 = vector.broadcast %18 : i1 to vector<24x24xi1>
    %20 = vector.broadcast %19 : vector<24x24xi1> to vector<24x24xi1>
    %21 = arith.xori %17, %20 : vector<24x24xi1>
    %22 = arith.andi %21, %15 : vector<24x24xi1>
    %23 = vector.broadcast %11 : i32 to vector<24x24xi32>
    %24 = arith.addi %13, %23 : vector<24x24xi32>
    %25 = arith.select %22, %24, %13 : vector<24x24xi1>, vector<24x24xi32>
    %26 = tpu.iota {dimensions = array<i32: 1>} : vector<24x24xi32>
    %c8_i32_15 = arith.constant 8 : i32
    %c0_i32_16 = arith.constant 0 : i32
    %27 = arith.cmpi eq, %c8_i32_15, %c0_i32_16 : i32
    %c1_i32_17 = arith.constant 1 : i32
    %28 = arith.select %27, %c1_i32_17, %c8_i32_15 : i32
    %29 = vector.broadcast %28 : i32 to vector<24x24xi32>
    %30 = arith.remsi %26, %29 : vector<24x24xi32>
    %c0_i32_18 = arith.constant 0 : i32
    %31 = vector.broadcast %c0_i32_18 : i32 to vector<24x24xi32>
    %32 = arith.cmpi ne, %30, %31 : vector<24x24xi32>
    %c0_i32_19 = arith.constant 0 : i32
    %33 = vector.broadcast %c0_i32_19 : i32 to vector<24x24xi32>
    %34 = arith.cmpi slt, %30, %33 : vector<24x24xi32>
    %c0_i32_20 = arith.constant 0 : i32
    %35 = arith.cmpi slt, %28, %c0_i32_20 : i32
    %36 = vector.broadcast %35 : i1 to vector<24x24xi1>
    %37 = vector.broadcast %36 : vector<24x24xi1> to vector<24x24xi1>
    %38 = arith.xori %34, %37 : vector<24x24xi1>
    %39 = arith.andi %38, %32 : vector<24x24xi1>
    %40 = vector.broadcast %28 : i32 to vector<24x24xi32>
    %41 = arith.addi %30, %40 : vector<24x24xi32>
    %42 = arith.select %39, %41, %30 : vector<24x24xi1>, vector<24x24xi32>
    %43 = arith.cmpi sle, %42, %25 : vector<24x24xi32>
    %cst_21 = arith.constant -1.000000e+30 : f32
    %44 = vector.broadcast %cst_21 : f32 to vector<24x24xf32>
    %45 = arith.select %43, %8, %44 : vector<24x24xi1>, vector<24x24xf32>
    %cst_22 = arith.constant dense<0xFF800000> : vector<24xf32>
    %46 = vector.multi_reduction <maximumf>, %45, %cst_22 [1] : vector<24x24xf32> to vector<24xf32>
    %47 = vector.shape_cast %46 : vector<24xf32> to vector<24x1xf32>
    %48 = vector.broadcast %47 : vector<24x1xf32> to vector<24x24xf32>
    %49 = arith.subf %45, %48 : vector<24x24xf32>
    %50 = math.exp %49 : vector<24x24xf32>
    %cst_23 = arith.constant dense<0.000000e+00> : vector<24xf32>
    %51 = vector.multi_reduction <add>, %50, %cst_23 [1] : vector<24x24xf32> to vector<24xf32>
    %52 = vector.shape_cast %51 : vector<24xf32> to vector<24x1xf32>
    %53 = vector.broadcast %52 : vector<24x1xf32> to vector<24x24xf32>
    %54 = arith.divf %50, %53 : vector<24x24xf32>
    %55 = arith.truncf %54 : vector<24x24xf32> to vector<24x24xbf16>
    %cst_24 = arith.constant dense<0.000000e+00> : vector<24x32xf32>
    %56 = tpu.matmul %55, %5, %cst_24 {dimension_numbers = #tpu.dot_dimension_numbers<[1], [0], [0], [1], [0, 0, 1, 1], [], []>} : vector<24x24xbf16>, vector<24x32xbf16>, vector<24x32xf32> -> vector<24x32xf32>
    %57 = arith.truncf %56 : vector<24x32xf32> to vector<24x32xbf16>
    %c0_25 = arith.constant 0 : index
    %c0_26 = arith.constant 0 : index
    %c0_27 = arith.constant 0 : index
    %c0_28 = arith.constant 0 : index
    %58 = vector.load %arg5[%c0_25, %c0_26, %c0_27, %c0_28] : memref<1x1x24x32xbf16, #tpu.memory_space<vmem>>, vector<1x1x24x32xbf16>
    %59 = vector.shape_cast %58 : vector<1x1x24x32xbf16> to vector<24x32xbf16>
    %60 = vector.shape_cast %57 : vector<24x32xbf16> to vector<1x1x24x32xbf16>
    tpu.vector_store %arg5[%c0_25, %c0_26, %c0_27, %c0_28], %60 {strides = array<i32>} : memref<1x1x24x32xbf16, #tpu.memory_space<vmem>>, vector<1x1x24x32xbf16>,
    return
  }
  func.func @transform_0(%arg0: i32, %arg1: i32) -> (i32, i32, i32, i32) {
    %c0_i32 = arith.constant 0 : i32
    %c0_i32_0 = arith.constant 0 : i32
    %c0_i32_1 = arith.constant 0 : i32
    return %arg0, %arg1, %c0_i32, %c0_i32_0 : i32, i32, i32, i32
  }
  func.func @transform_1(%arg0: i32, %arg1: i32) -> (i32, i32, i32, i32) {
    %c0_i32 = arith.constant 0 : i32
    %c0_i32_0 = arith.constant 0 : i32
    %c0_i32_1 = arith.constant 0 : i32
    return %arg0, %arg1, %c0_i32, %c0_i32_0 : i32, i32, i32, i32
  }
  func.func @transform_2(%arg0: i32, %arg1: i32) -> (i32, i32, i32, i32) {
    %c0_i32 = arith.constant 0 : i32
    %c0_i32_0 = arith.constant 0 : i32
    %c0_i32_1 = arith.constant 0 : i32
    return %arg0, %arg1, %c0_i32, %c0_i32_0 : i32, i32, i32, i32
  }
  func.func @transform_3(%arg0: i32, %arg1: i32) -> (i32, i32, i32, i32) {
    %c0_i32 = arith.constant 0 : i32
    %c0_i32_0 = arith.constant 0 : i32
    %c0_i32_1 = arith.constant 0 : i32
    return %arg0, %arg1, %c0_i32, %c0_i32_0 : i32, i32, i32, i32
  }
}

module attributes {stable_mosaic.version = 11 : i64} {
  func.func @_ln_kernel(%arg0: i32, %arg1: memref<48x128xf32, #tpu.memory_space<vmem>>, %arg2: memref<1x128xf32, #tpu.memory_space<vmem>>, %arg3: memref<1x128xf32, #tpu.memory_space<vmem>>, %arg4: memref<48x128xbf16, #tpu.memory_space<vmem>>) attributes {dimension_semantics = [#tpu.dimension_semantics<parallel>], iteration_bounds = array<i64: 1>, scalar_prefetch = 0 : i64, scratch_operands = 0 : i64, tpu.core_type = #tpu.core_type<tc>, window_params = [{transform_indices = @transform_0, window_bounds = array<i64: 48, 128>}, {pipeline_mode = #tpu.pipeline_mode<synchronous>, transform_indices = @transform_1, window_bounds = array<i64: 1, 128>}, {pipeline_mode = #tpu.pipeline_mode<synchronous>, transform_indices = @transform_2, window_bounds = array<i64: 1, 128>}, {transform_indices = @transform_3, window_bounds = array<i64: 48, 128>}]} {
    %c0 = arith.constant 0 : index
    %c0_0 = arith.constant 0 : index
    %0 = vector.load %arg1[%c0, %c0_0] : memref<48x128xf32, #tpu.memory_space<vmem>>, vector<48x128xf32>
    %cst = arith.constant dense<0.000000e+00> : vector<48xf32>
    %1 = vector.multi_reduction <add>, %0, %cst [1] : vector<48x128xf32> to vector<48xf32>
    %2 = vector.shape_cast %1 : vector<48xf32> to vector<48x1xf32>
    %cst_1 = arith.constant 1.280000e+02 : f32
    %3 = vector.broadcast %cst_1 : f32 to vector<48x1xf32>
    %4 = arith.divf %2, %3 : vector<48x1xf32>
    %5 = vector.broadcast %4 : vector<48x1xf32> to vector<48x128xf32>
    %6 = arith.subf %0, %5 : vector<48x128xf32>
    %7 = arith.mulf %6, %6 : vector<48x128xf32>
    %cst_2 = arith.constant dense<0.000000e+00> : vector<48xf32>
    %8 = vector.multi_reduction <add>, %7, %cst_2 [1] : vector<48x128xf32> to vector<48xf32>
    %9 = vector.shape_cast %8 : vector<48xf32> to vector<48x1xf32>
    %cst_3 = arith.constant 1.280000e+02 : f32
    %10 = vector.broadcast %cst_3 : f32 to vector<48x1xf32>
    %11 = arith.divf %9, %10 : vector<48x1xf32>
    %cst_4 = arith.constant 9.99999974E-6 : f32
    %12 = vector.broadcast %cst_4 : f32 to vector<48x1xf32>
    %13 = arith.addf %11, %12 : vector<48x1xf32>
    %14 = math.rsqrt %13 : vector<48x1xf32>
    %15 = vector.broadcast %14 : vector<48x1xf32> to vector<48x128xf32>
    %16 = arith.mulf %6, %15 : vector<48x128xf32>
    %c0_5 = arith.constant 0 : index
    %c0_6 = arith.constant 0 : index
    %17 = vector.load %arg2[%c0_5, %c0_6] : memref<1x128xf32, #tpu.memory_space<vmem>>, vector<1x128xf32>
    %18 = vector.broadcast %17 : vector<1x128xf32> to vector<48x128xf32>
    %19 = arith.mulf %16, %18 : vector<48x128xf32>
    %c0_7 = arith.constant 0 : index
    %c0_8 = arith.constant 0 : index
    %20 = vector.load %arg3[%c0_7, %c0_8] : memref<1x128xf32, #tpu.memory_space<vmem>>, vector<1x128xf32>
    %21 = vector.broadcast %20 : vector<1x128xf32> to vector<48x128xf32>
    %22 = arith.addf %19, %21 : vector<48x128xf32>
    %23 = arith.truncf %22 : vector<48x128xf32> to vector<48x128xbf16>
    %c0_9 = arith.constant 0 : index
    %c0_10 = arith.constant 0 : index
    %24 = vector.load %arg4[%c0_9, %c0_10] : memref<48x128xbf16, #tpu.memory_space<vmem>>, vector<48x128xbf16>
    tpu.vector_store %arg4[%c0_9, %c0_10], %23 {strides = array<i32>} : memref<48x128xbf16, #tpu.memory_space<vmem>>, vector<48x128xbf16>,
    return
  }
  func.func @transform_0(%arg0: i32) -> (i32, i32) {
    %c0_i32 = arith.constant 0 : i32
    %c0_i32_0 = arith.constant 0 : i32
    return %arg0, %c0_i32 : i32, i32
  }
  func.func @transform_1(%arg0: i32) -> (i32, i32) {
    %c0_i32 = arith.constant 0 : i32
    %c0_i32_0 = arith.constant 0 : i32
    %c0_i32_1 = arith.constant 0 : i32
    return %c0_i32, %c0_i32_0 : i32, i32
  }
  func.func @transform_2(%arg0: i32) -> (i32, i32) {
    %c0_i32 = arith.constant 0 : i32
    %c0_i32_0 = arith.constant 0 : i32
    %c0_i32_1 = arith.constant 0 : i32
    return %c0_i32, %c0_i32_0 : i32, i32
  }
  func.func @transform_3(%arg0: i32) -> (i32, i32) {
    %c0_i32 = arith.constant 0 : i32
    %c0_i32_0 = arith.constant 0 : i32
    return %arg0, %c0_i32 : i32, i32
  }
}

module attributes {stable_mosaic.version = 11 : i64} {
  func.func @kernel(%arg0: i32, %arg1: i32, %arg2: memref<48x128xbf16, #tpu.memory_space<vmem>>, %arg3: memref<128x128xbf16, #tpu.memory_space<vmem>>, %arg4: memref<1x128xf32, #tpu.memory_space<vmem>>, %arg5: memref<48x128xf32, #tpu.memory_space<vmem>>, %arg6: memref<48x128xf32, #tpu.memory_space<vmem>>) attributes {dimension_semantics = [#tpu.dimension_semantics<parallel>, #tpu.dimension_semantics<parallel>], iteration_bounds = array<i64: 1, 1>, scalar_prefetch = 0 : i64, scratch_operands = 0 : i64, tpu.core_type = #tpu.core_type<tc>, window_params = [{transform_indices = @transform_0, window_bounds = array<i64: 48, 128>}, {transform_indices = @transform_1, window_bounds = array<i64: 128, 128>}, {transform_indices = @transform_2, window_bounds = array<i64: 1, 128>}, {transform_indices = @transform_3, window_bounds = array<i64: 48, 128>}, {transform_indices = @transform_4, window_bounds = array<i64: 48, 128>}]} {
    %c0 = arith.constant 0 : index
    %c0_0 = arith.constant 0 : index
    %0 = vector.load %arg2[%c0, %c0_0] : memref<48x128xbf16, #tpu.memory_space<vmem>>, vector<48x128xbf16>
    %c0_1 = arith.constant 0 : index
    %c0_2 = arith.constant 0 : index
    %1 = vector.load %arg3[%c0_1, %c0_2] : memref<128x128xbf16, #tpu.memory_space<vmem>>, vector<128x128xbf16>
    %cst = arith.constant dense<0.000000e+00> : vector<48x128xf32>
    %2 = tpu.matmul %0, %1, %cst {dimension_numbers = #tpu.dot_dimension_numbers<[1], [0], [0], [1], [0, 0, 1, 1], [], []>} : vector<48x128xbf16>, vector<128x128xbf16>, vector<48x128xf32> -> vector<48x128xf32>
    %c0_3 = arith.constant 0 : index
    %c0_4 = arith.constant 0 : index
    %3 = vector.load %arg4[%c0_3, %c0_4] : memref<1x128xf32, #tpu.memory_space<vmem>>, vector<1x128xf32>
    %4 = vector.broadcast %3 : vector<1x128xf32> to vector<48x128xf32>
    %5 = arith.addf %2, %4 : vector<48x128xf32>
    %c0_5 = arith.constant 0 : index
    %c0_6 = arith.constant 0 : index
    %6 = vector.load %arg5[%c0_5, %c0_6] : memref<48x128xf32, #tpu.memory_space<vmem>>, vector<48x128xf32>
    %7 = arith.addf %5, %6 : vector<48x128xf32>
    %c0_7 = arith.constant 0 : index
    %c0_8 = arith.constant 0 : index
    %8 = vector.load %arg6[%c0_7, %c0_8] : memref<48x128xf32, #tpu.memory_space<vmem>>, vector<48x128xf32>
    tpu.vector_store %arg6[%c0_7, %c0_8], %7 {strides = array<i32>} : memref<48x128xf32, #tpu.memory_space<vmem>>, vector<48x128xf32>,
    return
  }
  func.func @transform_0(%arg0: i32, %arg1: i32) -> (i32, i32) {
    %c0_i32 = arith.constant 0 : i32
    %c0_i32_0 = arith.constant 0 : i32
    return %arg0, %c0_i32 : i32, i32
  }
  func.func @transform_1(%arg0: i32, %arg1: i32) -> (i32, i32) {
    %c0_i32 = arith.constant 0 : i32
    %c0_i32_0 = arith.constant 0 : i32
    return %c0_i32, %arg1 : i32, i32
  }
  func.func @transform_2(%arg0: i32, %arg1: i32) -> (i32, i32) {
    %c0_i32 = arith.constant 0 : i32
    %c0_i32_0 = arith.constant 0 : i32
    return %c0_i32, %arg1 : i32, i32
  }
  func.func @transform_3(%arg0: i32, %arg1: i32) -> (i32, i32) {
    %c0_i32 = arith.constant 0 : i32
    return %arg0, %arg1 : i32, i32
  }
  func.func @transform_4(%arg0: i32, %arg1: i32) -> (i32, i32) {
    %c0_i32 = arith.constant 0 : i32
    return %arg0, %arg1 : i32, i32
  }
}

module attributes {stable_mosaic.version = 11 : i64} {
  func.func @kernel(%arg0: i32, %arg1: i32, %arg2: memref<48x128xbf16, #tpu.memory_space<vmem>>, %arg3: memref<128x256xbf16, #tpu.memory_space<vmem>>, %arg4: memref<1x256xf32, #tpu.memory_space<vmem>>, %arg5: memref<48x256xbf16, #tpu.memory_space<vmem>>) attributes {dimension_semantics = [#tpu.dimension_semantics<parallel>, #tpu.dimension_semantics<parallel>], iteration_bounds = array<i64: 1, 2>, scalar_prefetch = 0 : i64, scratch_operands = 0 : i64, tpu.core_type = #tpu.core_type<tc>, window_params = [{transform_indices = @transform_0, window_bounds = array<i64: 48, 128>}, {transform_indices = @transform_1, window_bounds = array<i64: 128, 256>}, {transform_indices = @transform_2, window_bounds = array<i64: 1, 256>}, {transform_indices = @transform_3, window_bounds = array<i64: 48, 256>}]} {
    %c0 = arith.constant 0 : index
    %c0_0 = arith.constant 0 : index
    %0 = vector.load %arg2[%c0, %c0_0] : memref<48x128xbf16, #tpu.memory_space<vmem>>, vector<48x128xbf16>
    %c0_1 = arith.constant 0 : index
    %c0_2 = arith.constant 0 : index
    %1 = vector.load %arg3[%c0_1, %c0_2] : memref<128x256xbf16, #tpu.memory_space<vmem>>, vector<128x256xbf16>
    %cst = arith.constant dense<0.000000e+00> : vector<48x256xf32>
    %2 = tpu.matmul %0, %1, %cst {dimension_numbers = #tpu.dot_dimension_numbers<[1], [0], [0], [1], [0, 0, 1, 1], [], []>} : vector<48x128xbf16>, vector<128x256xbf16>, vector<48x256xf32> -> vector<48x256xf32>
    %c0_3 = arith.constant 0 : index
    %c0_4 = arith.constant 0 : index
    %3 = vector.load %arg4[%c0_3, %c0_4] : memref<1x256xf32, #tpu.memory_space<vmem>>, vector<1x256xf32>
    %4 = vector.broadcast %3 : vector<1x256xf32> to vector<48x256xf32>
    %5 = arith.addf %2, %4 : vector<48x256xf32>
    %cst_5 = arith.constant 5.000000e-01 : f32
    %6 = vector.broadcast %cst_5 : f32 to vector<48x256xf32>
    %7 = arith.mulf %6, %5 : vector<48x256xf32>
    %cst_6 = arith.constant 4.471500e-02 : f32
    %8 = vector.broadcast %cst_6 : f32 to vector<48x256xf32>
    %9 = arith.mulf %8, %5 : vector<48x256xf32>
    %10 = arith.mulf %9, %5 : vector<48x256xf32>
    %11 = arith.mulf %10, %5 : vector<48x256xf32>
    %12 = arith.addf %5, %11 : vector<48x256xf32>
    %cst_7 = arith.constant 0.797884583 : f32
    %13 = vector.broadcast %cst_7 : f32 to vector<48x256xf32>
    %14 = arith.mulf %13, %12 : vector<48x256xf32>
    %15 = math.tanh %14 : vector<48x256xf32>
    %cst_8 = arith.constant 1.000000e+00 : f32
    %16 = vector.broadcast %cst_8 : f32 to vector<48x256xf32>
    %17 = arith.addf %16, %15 : vector<48x256xf32>
    %18 = arith.mulf %7, %17 : vector<48x256xf32>
    %19 = arith.truncf %18 : vector<48x256xf32> to vector<48x256xbf16>
    %c0_9 = arith.constant 0 : index
    %c0_10 = arith.constant 0 : index
    %20 = vector.load %arg5[%c0_9, %c0_10] : memref<48x256xbf16, #tpu.memory_space<vmem>>, vector<48x256xbf16>
    tpu.vector_store %arg5[%c0_9, %c0_10], %19 {strides = array<i32>} : memref<48x256xbf16, #tpu.memory_space<vmem>>, vector<48x256xbf16>,
    return
  }
  func.func @transform_0(%arg0: i32, %arg1: i32) -> (i32, i32) {
    %c0_i32 = arith.constant 0 : i32
    %c0_i32_0 = arith.constant 0 : i32
    return %arg0, %c0_i32 : i32, i32
  }
  func.func @transform_1(%arg0: i32, %arg1: i32) -> (i32, i32) {
    %c0_i32 = arith.constant 0 : i32
    %c0_i32_0 = arith.constant 0 : i32
    return %c0_i32, %arg1 : i32, i32
  }
  func.func @transform_2(%arg0: i32, %arg1: i32) -> (i32, i32) {
    %c0_i32 = arith.constant 0 : i32
    %c0_i32_0 = arith.constant 0 : i32
    return %c0_i32, %arg1 : i32, i32
  }
  func.func @transform_3(%arg0: i32, %arg1: i32) -> (i32, i32) {
    %c0_i32 = arith.constant 0 : i32
    return %arg0, %arg1 : i32, i32
  }
}

module attributes {stable_mosaic.version = 11 : i64} {
  func.func @kernel(%arg0: i32, %arg1: i32, %arg2: memref<48x512xbf16, #tpu.memory_space<vmem>>, %arg3: memref<512x128xbf16, #tpu.memory_space<vmem>>, %arg4: memref<1x128xf32, #tpu.memory_space<vmem>>, %arg5: memref<48x128xf32, #tpu.memory_space<vmem>>, %arg6: memref<48x128xf32, #tpu.memory_space<vmem>>) attributes {dimension_semantics = [#tpu.dimension_semantics<parallel>, #tpu.dimension_semantics<parallel>], iteration_bounds = array<i64: 1, 1>, scalar_prefetch = 0 : i64, scratch_operands = 0 : i64, tpu.core_type = #tpu.core_type<tc>, window_params = [{transform_indices = @transform_0, window_bounds = array<i64: 48, 512>}, {transform_indices = @transform_1, window_bounds = array<i64: 512, 128>}, {transform_indices = @transform_2, window_bounds = array<i64: 1, 128>}, {transform_indices = @transform_3, window_bounds = array<i64: 48, 128>}, {transform_indices = @transform_4, window_bounds = array<i64: 48, 128>}]} {
    %c0 = arith.constant 0 : index
    %c0_0 = arith.constant 0 : index
    %0 = vector.load %arg2[%c0, %c0_0] : memref<48x512xbf16, #tpu.memory_space<vmem>>, vector<48x512xbf16>
    %c0_1 = arith.constant 0 : index
    %c0_2 = arith.constant 0 : index
    %1 = vector.load %arg3[%c0_1, %c0_2] : memref<512x128xbf16, #tpu.memory_space<vmem>>, vector<512x128xbf16>
    %cst = arith.constant dense<0.000000e+00> : vector<48x128xf32>
    %2 = tpu.matmul %0, %1, %cst {dimension_numbers = #tpu.dot_dimension_numbers<[1], [0], [0], [1], [0, 0, 1, 1], [], []>} : vector<48x512xbf16>, vector<512x128xbf16>, vector<48x128xf32> -> vector<48x128xf32>
    %c0_3 = arith.constant 0 : index
    %c0_4 = arith.constant 0 : index
    %3 = vector.load %arg4[%c0_3, %c0_4] : memref<1x128xf32, #tpu.memory_space<vmem>>, vector<1x128xf32>
    %4 = vector.broadcast %3 : vector<1x128xf32> to vector<48x128xf32>
    %5 = arith.addf %2, %4 : vector<48x128xf32>
    %c0_5 = arith.constant 0 : index
    %c0_6 = arith.constant 0 : index
    %6 = vector.load %arg5[%c0_5, %c0_6] : memref<48x128xf32, #tpu.memory_space<vmem>>, vector<48x128xf32>
    %7 = arith.addf %5, %6 : vector<48x128xf32>
    %c0_7 = arith.constant 0 : index
    %c0_8 = arith.constant 0 : index
    %8 = vector.load %arg6[%c0_7, %c0_8] : memref<48x128xf32, #tpu.memory_space<vmem>>, vector<48x128xf32>
    tpu.vector_store %arg6[%c0_7, %c0_8], %7 {strides = array<i32>} : memref<48x128xf32, #tpu.memory_space<vmem>>, vector<48x128xf32>,
    return
  }
  func.func @transform_0(%arg0: i32, %arg1: i32) -> (i32, i32) {
    %c0_i32 = arith.constant 0 : i32
    %c0_i32_0 = arith.constant 0 : i32
    return %arg0, %c0_i32 : i32, i32
  }
  func.func @transform_1(%arg0: i32, %arg1: i32) -> (i32, i32) {
    %c0_i32 = arith.constant 0 : i32
    %c0_i32_0 = arith.constant 0 : i32
    return %c0_i32, %arg1 : i32, i32
  }
  func.func @transform_2(%arg0: i32, %arg1: i32) -> (i32, i32) {
    %c0_i32 = arith.constant 0 : i32
    %c0_i32_0 = arith.constant 0 : i32
    return %c0_i32, %arg1 : i32, i32
  }
  func.func @transform_3(%arg0: i32, %arg1: i32) -> (i32, i32) {
    %c0_i32 = arith.constant 0 : i32
    return %arg0, %arg1 : i32, i32
  }
  func.func @transform_4(%arg0: i32, %arg1: i32) -> (i32, i32) {
    %c0_i32 = arith.constant 0 : i32
    return %arg0, %arg1 : i32, i32
  }
}

module attributes {stable_mosaic.version = 11 : i64} {
  func.func @kernel(%arg0: i32, %arg1: i32, %arg2: memref<48x128xbf16, #tpu.memory_space<vmem>>, %arg3: memref<128x128xbf16, #tpu.memory_space<vmem>>, %arg4: memref<1x128xf32, #tpu.memory_space<vmem>>, %arg5: memref<48x128xbf16, #tpu.memory_space<vmem>>) attributes {dimension_semantics = [#tpu.dimension_semantics<parallel>, #tpu.dimension_semantics<parallel>], iteration_bounds = array<i64: 1, 3>, scalar_prefetch = 0 : i64, scratch_operands = 0 : i64, tpu.core_type = #tpu.core_type<tc>, window_params = [{transform_indices = @transform_0, window_bounds = array<i64: 48, 128>}, {transform_indices = @transform_1, window_bounds = array<i64: 128, 128>}, {transform_indices = @transform_2, window_bounds = array<i64: 1, 128>}, {transform_indices = @transform_3, window_bounds = array<i64: 48, 128>}]} {
    %c0 = arith.constant 0 : index
    %c0_0 = arith.constant 0 : index
    %0 = vector.load %arg2[%c0, %c0_0] : memref<48x128xbf16, #tpu.memory_space<vmem>>, vector<48x128xbf16>
    %c0_1 = arith.constant 0 : index
    %c0_2 = arith.constant 0 : index
    %1 = vector.load %arg3[%c0_1, %c0_2] : memref<128x128xbf16, #tpu.memory_space<vmem>>, vector<128x128xbf16>
    %cst = arith.constant dense<0.000000e+00> : vector<48x128xf32>
    %2 = tpu.matmul %0, %1, %cst {dimension_numbers = #tpu.dot_dimension_numbers<[1], [0], [0], [1], [0, 0, 1, 1], [], []>} : vector<48x128xbf16>, vector<128x128xbf16>, vector<48x128xf32> -> vector<48x128xf32>
    %c0_3 = arith.constant 0 : index
    %c0_4 = arith.constant 0 : index
    %3 = vector.load %arg4[%c0_3, %c0_4] : memref<1x128xf32, #tpu.memory_space<vmem>>, vector<1x128xf32>
    %4 = vector.broadcast %3 : vector<1x128xf32> to vector<48x128xf32>
    %5 = arith.addf %2, %4 : vector<48x128xf32>
    %6 = arith.truncf %5 : vector<48x128xf32> to vector<48x128xbf16>
    %c0_5 = arith.constant 0 : index
    %c0_6 = arith.constant 0 : index
    %7 = vector.load %arg5[%c0_5, %c0_6] : memref<48x128xbf16, #tpu.memory_space<vmem>>, vector<48x128xbf16>
    tpu.vector_store %arg5[%c0_5, %c0_6], %6 {strides = array<i32>} : memref<48x128xbf16, #tpu.memory_space<vmem>>, vector<48x128xbf16>,
    return
  }
  func.func @transform_0(%arg0: i32, %arg1: i32) -> (i32, i32) {
    %c0_i32 = arith.constant 0 : i32
    %c0_i32_0 = arith.constant 0 : i32
    return %arg0, %c0_i32 : i32, i32
  }
  func.func @transform_1(%arg0: i32, %arg1: i32) -> (i32, i32) {
    %c0_i32 = arith.constant 0 : i32
    %c0_i32_0 = arith.constant 0 : i32
    return %c0_i32, %arg1 : i32, i32
  }
  func.func @transform_2(%arg0: i32, %arg1: i32) -> (i32, i32) {
    %c0_i32 = arith.constant 0 : i32
    %c0_i32_0 = arith.constant 0 : i32
    return %c0_i32, %arg1 : i32, i32
  }
  func.func @transform_3(%arg0: i32, %arg1: i32) -> (i32, i32) {
    %c0_i32 = arith.constant 0 : i32
    return %arg0, %arg1 : i32, i32
  }
}

module attributes {stable_mosaic.version = 11 : i64} {
  func.func @kernel(%arg0: i32, %arg1: i32, %arg2: memref<16x128xbf16, #tpu.memory_space<vmem>>, %arg3: memref<128x128xbf16, #tpu.memory_space<vmem>>, %arg4: memref<16x128xf32, #tpu.memory_space<vmem>>) attributes {dimension_semantics = [#tpu.dimension_semantics<parallel>, #tpu.dimension_semantics<parallel>], iteration_bounds = array<i64: 1, 1>, scalar_prefetch = 0 : i64, scratch_operands = 0 : i64, tpu.core_type = #tpu.core_type<tc>, window_params = [{transform_indices = @transform_0, window_bounds = array<i64: 16, 128>}, {transform_indices = @transform_1, window_bounds = array<i64: 128, 128>}, {transform_indices = @transform_2, window_bounds = array<i64: 16, 128>}]} {
    %c0 = arith.constant 0 : index
    %c0_0 = arith.constant 0 : index
    %0 = vector.load %arg2[%c0, %c0_0] : memref<16x128xbf16, #tpu.memory_space<vmem>>, vector<16x128xbf16>
    %c0_1 = arith.constant 0 : index
    %c0_2 = arith.constant 0 : index
    %1 = vector.load %arg3[%c0_1, %c0_2] : memref<128x128xbf16, #tpu.memory_space<vmem>>, vector<128x128xbf16>
    %cst = arith.constant dense<0.000000e+00> : vector<16x128xf32>
    %2 = tpu.matmul %0, %1, %cst {dimension_numbers = #tpu.dot_dimension_numbers<[1], [0], [0], [1], [0, 0, 1, 1], [], []>} : vector<16x128xbf16>, vector<128x128xbf16>, vector<16x128xf32> -> vector<16x128xf32>
    %c0_3 = arith.constant 0 : index
    %c0_4 = arith.constant 0 : index
    %3 = vector.load %arg4[%c0_3, %c0_4] : memref<16x128xf32, #tpu.memory_space<vmem>>, vector<16x128xf32>
    tpu.vector_store %arg4[%c0_3, %c0_4], %2 {strides = array<i32>} : memref<16x128xf32, #tpu.memory_space<vmem>>, vector<16x128xf32>,
    return
  }
  func.func @transform_0(%arg0: i32, %arg1: i32) -> (i32, i32) {
    %c0_i32 = arith.constant 0 : i32
    %c0_i32_0 = arith.constant 0 : i32
    return %arg0, %c0_i32 : i32, i32
  }
  func.func @transform_1(%arg0: i32, %arg1: i32) -> (i32, i32) {
    %c0_i32 = arith.constant 0 : i32
    %c0_i32_0 = arith.constant 0 : i32
    return %c0_i32, %arg1 : i32, i32
  }
  func.func @transform_2(%arg0: i32, %arg1: i32) -> (i32, i32) {
    %c0_i32 = arith.constant 0 : i32
    return %arg0, %arg1 : i32, i32
  }
}

</mosaic_0001>

<bundles_post_ra>
// kernel: gpt_head_forward.18
= control target key start
LH: loop header
LB: loop body
LE: loop exit
PB: predicated region body
PF: predicated region fallthrough
CT: control target
= control target key end

     0   :  { %8 = vsyncpa [#allocation3], 0  ;;  %s1008_s0 = inlined_call_operand.vmem [shape: bf16[48,128], index: 0, kind: input, shape index: {}]   ;;  %s1009_s1 = inlined_call_operand.hbm [shape: bf16[128,384], index: 1, kind: input, shape index: {}]   ;;  %s1010_s2 = inlined_call_operand.vmem [shape: f32[1,384], index: 2, kind: input, shape index: {}]   ;;  %s1011_s3 = inlined_call_operand.vmem [shape: bf16[48,384], index: 3, kind: output, shape index: {}]  }
   0x1   :  { %10 = vsyncpa [#allocation3 + $0x1], 0  ;;  %s873_s12 = smov 0   ;;  %s875_s13 = smov 0  }
   0x2   :  { %s877_s14 = smov 0   ;;  %s879_s15 = smov 0  }
   0x3   :  { %s881_s16 = smov 0   ;;  %s883_s17 = smov 0  }
   0x4 LB: > { %s587_s18 = sadd.s32 4294967295, %s845_s17   ;;  %s25_s19 = sadd.s32 1, %s841_s16  ;;  %s845_s17 = sphi %s883_s17, %s16_s17   ;;  %s841_s16 = sphi %s881_s16, %s1020_s16   ;;  %s837_s15 = sphi %s879_s15, %s1019_s15   ;;  %s833_s14 = sphi %s877_s14, %s1018_s14   ;;  %s829_s13 = sphi %s875_s13, %s1017_s13   ;;  %s825_s12 = sphi %s873_s12, %s1016_s12  }
   0x5   : > { %p26_p0 = scmp.ge.s32.totalorder %s25_s19, 3  ;;  %s61_s20 = sadd.s32 1, %s833_s14 }
   0x6   : > { %p68_p1 = scmp.ne.s32.totalorder %s833_s14, %s829_s13  ;;  %p69_p2 = scmp.eq.s32.totalorder %s845_s17, 0 }
   0x7   : > { %s1022_s19 = smov (%p26_p0, %s25_s19), 0  ;;  %p74_p4 = scmp.ne.s32.totalorder %s829_s13, %s825_s12 }
   0x8   : > { %p909_p3 = por %p69_p2, %p68_p1  ;;  %s58_s22 = ssub.s32 %s841_s16, %s1022_s19 }
   0x9   : > { %p75_p5 = scmp.eq.s32.totalorder %s587_s18, 0  ;;  %p59_p6 = scmp.eq.s32.totalorder %s58_s22, 0 }
   0xa   : > { %p126_p7 = scmp.eq.s32.totalorder %s587_s18, 2  ;;  %p702_p10 = scmp.lt.s32.totalorder %s845_s17, 3 }
   0xb   : > { %p916_p8 = por %p75_p5, %p74_p4  ;;  %s161_s26 = sand.u32 1, %s833_s14  }
   0xc   : > { %s921_s24 = scalar_select %p59_p6, %s833_s14, %s61_s20  }
   0xd   : > { %p923_p9 = por %p126_p7, %p68_p1  ;;  %s593_s27 = sshll.u32 %s841_s16, 6 }
   0xe   : > { %s592_s28 = sshll.u32 %s161_s26, 6  ;;  %s170_s4 = scalar_lea.hbm %s1009_s1, %s593_s27 }
   0xf   : > { %s165_s5 = scalar_lea.vmem [#allocation2], %s592_s28  ;;  %p935_p11 = pnand %p702_p10, %p909_p3 }
  0x10   : > { %s171_s6 = sshll.u32 %s165_s5, 4  ;;  %p594_p12 = scmp.ge.s32.totalorder %s845_s17, 1  ;;  %s172_s6 = int_to_ptr.vmem [resolvable:$true] %s171_s6 }
  0x11   : > { %s162_s8 = scalar_lea.sflag [#allocation3], %s161_s26  ;;  %p769_p13 = pneg %p935_p11 }
  0x12   : > { %s780_s9 = scalar_lea.vmem %s172_s6, 1024  ;;  %s847_s10 = smov [#allocation2]  }
  0x13   : > { %p781_p0 = scmp.ne.s32.totalorder %s172_s6, %s780_s9  ;;  %s785_s11 = sshll.u32 %s847_s10, 4  ;;  %s786_s11 = int_to_ptr.vmem [resolvable:$false] %s785_s11 }
  0x14   : > { %s787_s12 = scalar_lea.vmem %s786_s11, 2048  ;;  %p788_p4 = scmp.lt.s32.totalorder %s172_s6, %s786_s11 }
  0x15   : > { %p783_p1 = pnand %p781_p0, %p769_p13  ;;  %p789_p5 = scmp.lt.s32.totalorder %s787_s12, %s780_s9 }
  0x17   : > { %p784_p2 = pneg %p783_p1  ;;  %p790_p3 = por %p789_p5, %p788_p4 }
  0x19   : > { %p791_p6 = pnand %p790_p3, %p784_p2 }
  0x1b   : > { %794 = shalt.err (!%p791_p6)
}
  0x1c   : > { %s848_s18 = smov 192   ;;  %s849_s20 = smov 64  }
  0x1d   : > { %s850_s21 = smov 4   ;;  %p185_p7 = scmp.lt.s32.totalorder %s845_s17, 4 }
  0x1e   : > { %701 = dma.hbm_to_vmem [thread:$0]  (!%p935_p11), %s170_s4, 1024, %s172_s6, %s162_s8, %s848_s18, %s849_s20, %s850_s21  }
  0x1f   : > { %p186_p10 = pnand %p594_p12, %p185_p7 }
  0x20   : > { %s948_s22 = sand.u32 (!%p186_p10), 1, %s829_s13  }
  0x21   : > { %189 = sbr.rel (%p186_p10) target bundleno = 291 (0x123), region = 32  ;;  %s595_s26 = sshll.u32 (!%p186_p10), %s948_s22, 6 }
  0x22   : > { %s192_s27 = scalar_lea.sflag (!%p186_p10), [#allocation3], %s948_s22  ;;  %s952_s28 = scalar_lea.vmem (!%p186_p10), [#allocation2], %s595_s26 }
  0x26   : > { %820 = dma.done.wait (%p916_p8), %s192_s27, 1024  }
  0x27   : > { %822 = vsyncadd (%p916_p8), %s192_s27, 4294966272  ;;  %v851_v0 = vmov 0.0   ;;  %vm852_vm0 = vmmov 0   ;;  %v756_v1 = vld [vmem:[%s952_s28 + $0x38] sm:$0xff]   ;;  %v757_v2 = vld [vmem:[%s952_s28 + $0x30] sm:$0xff]   ;;  %p231_p8 = scmp.lt.s32.totalorder %s837_s15, 2 }
  0x28   : > { %679 = vmatprep.subr.bf16.mxu1 %v851_v0  ;;  %651 = vmatprep.subr.bf16.mxu0 %v851_v0  ;;  %v758_v3 = vld [vmem:[%s952_s28 + $0x28] sm:$0xff]   ;;  %v759_v4 = vld [vmem:[%s952_s28 + $0x20] sm:$0xff]   ;;  %v760_v5 = vld [vmem:[%s952_s28 + $0x18] sm:$0xff]   ;;  %s695_s11 = smul.u32 24, %s948_s22  ;;  %s614_s18 = sshll.u32 (%p923_p9), %s837_s15, 2 }
  0x29   : > { %671 = vmatprep.mubr.msk.bf16.mxu1 %vm852_vm0, %v851_v0  ;;  %667 = vmatprep.mubr.msk.bf16.mxu0 %vm852_vm0, %v851_v0  ;;  %v761_v6 = vld [vmem:[%s952_s28 + $0x10] sm:$0xff]   ;;  %v762_v7 = vld [vmem:[%s952_s28 + $0x8] sm:$0xff]   ;;  %v763_v8 = vld [vmem:[%s952_s28] sm:$0xff]   ;;  %s232_s7 = scalar_select %p231_p8, %s837_s15, 2 }
  0x2a   : > { %687 = vmatpush3.bf16.msra.mxu1 %v756_v1  ;;  %652 = vmatpush3.bf16.msra.mxu0 %v756_v1  ;;  %v764_v9 = vld [vmem:[%s1008_s0 + $0x8] sm:$0xff]   ;;  %v765_v10 = vld [vmem:[%s1008_s0] sm:$0xff]   ;;  %v766_v11 = vld [vmem:[%s1008_s0 + $0x10] sm:$0xff]   ;;  %s224_s12 = scalar_lea.vmem [#allocation4], %s695_s11  ;;  %s429_s22 = scalar_lea.vmem (%p923_p9), %s1011_s3, %s614_s18 }
  0x2b   : > { %680 = vmatprep.subr.bf16.mxu1 %v851_v0  ;;  %653 = vmatprep.subr.bf16.mxu0 %v851_v0  ;;  %s233_s10 = scalar_lea.vmem %s1010_s2, %s232_s7 }
  0x2c   : > { %v596_v14 = vld [vmem:[%s233_s10] ss:$0 sm:$0xff] }
  0x2e   : > { %688 = vmatpush3.bf16.msra.mxu1 %v757_v2  ;;  %654 = vmatpush3.bf16.msra.mxu0 %v757_v2 }
  0x2f   : > { %681 = vmatprep.subr.bf16.mxu1 %v851_v0  ;;  %655 = vmatprep.subr.bf16.mxu0 %v851_v0 }
  0x32   : > { %689 = vmatpush3.bf16.msra.mxu1 %v758_v3  ;;  %656 = vmatpush3.bf16.msra.mxu0 %v758_v3 }
  0x33   : > { %682 = vmatprep.subr.bf16.mxu1 %v851_v0  ;;  %657 = vmatprep.subr.bf16.mxu0 %v851_v0 }
  0x36   : > { %690 = vmatpush3.bf16.msra.mxu1 %v759_v4  ;;  %658 = vmatpush3.bf16.msra.mxu0 %v759_v4 }
  0x37   : > { %683 = vmatprep.subr.bf16.mxu1 %v851_v0  ;;  %659 = vmatprep.subr.bf16.mxu0 %v851_v0 }
  0x3a   : > { %691 = vmatpush3.bf16.msra.mxu1 %v760_v5  ;;  %660 = vmatpush3.bf16.msra.mxu0 %v760_v5 }
  0x3b   : > { %684 = vmatprep.subr.bf16.mxu1 %v851_v0  ;;  %661 = vmatprep.subr.bf16.mxu0 %v851_v0 }
  0x3e   : > { %692 = vmatpush3.bf16.msra.mxu1 %v761_v6  ;;  %662 = vmatpush3.bf16.msra.mxu0 %v761_v6 }
  0x3f   : > { %685 = vmatprep.subr.bf16.mxu1 %v851_v0  ;;  %663 = vmatprep.subr.bf16.mxu0 %v851_v0 }
  0x42   : > { %693 = vmatpush3.bf16.msra.mxu1 %v762_v7  ;;  %664 = vmatpush3.bf16.msra.mxu0 %v762_v7 }
  0x43   : > { %686 = vmatprep.subr.bf16.mxu1 %v851_v0  ;;  %665 = vmatprep.subr.bf16.mxu0 %v851_v0 }
  0x46   : > { %694 = vmatpush3.bf16.msra.mxu1 %v763_v8  ;;  %666 = vmatpush3.bf16.msra.mxu0 %v763_v8 }
  0x49   : > { %672 = vmatmul.mubr.bf16.vlgmr.msra.gmra.mxu1 %v764_v9  ;;  %668 = vmatmul.mubr.bf16.vlgmr.msra.gmra.mxu0 %v765_v10 }
  0x4a   : > { %675 = vmatprep.mubr.msk.bf16.mxu1 %vm852_vm0, %v851_v0 }
  0x51   : > { %676 = vmatmul.mubr.bf16.gmra.mxu1 %v766_v11 }
 0x109   : > { %v373_v12 = vpop.f32.mrf.mxu1  ;;  %v365_v13 = vpop.f32.mrf.mxu0 }
 0x10a   : > { %v366_v17 = vadd.f32 %v596_v14, %v365_v13  ;;  %v374_v20 = vadd.f32 %v596_v14, %v373_v12 }
 0x10b   : > { %v673_v15 = vpop.f32.mrf.mxu1  ;;  %v669_v16 = vpop.f32.mrf.mxu0 }
 0x10d   : > { %v376_v18 = vpop.f32.mrf.mxu1  ;;  %v368_v19 = vpop.f32.mrf.mxu0 }
 0x10e   : > { %v377_v21 = vadd.f32 %v596_v14, %v376_v18  ;;  %v369_v22 = vadd.f32 %v596_v14, %v368_v19 }
 0x10f   : > { %v674_v23 = vpop.f32.mrf.mxu1  ;;  %v670_v24 = vpop.f32.mrf.mxu0 }
 0x110   : > { %v631_v25 = vpack.c.bf16 %v377_v21, %v374_v20  ;;  %v626_v26 = vpack.c.bf16 %v369_v22, %v366_v17 }
 0x111   : > { %v381_v27 = vpop.f32.mrf.mxu1 }
 0x112   : > { %638 = vst [vmem:[%s224_s12 + $0x8] sm:$0xff] %v631_v25   ;;  %627 = vst [vmem:[%s224_s12] sm:$0xff] %v626_v26   ;;  %v382_v30 = vadd.f32 %v596_v14, %v381_v27 }
 0x113   : > { %v677_v28 = vpop.f32.mrf.mxu1 }
 0x115   : > { %v384_v29 = vpop.f32.mrf.mxu1 }
 0x116   : > { %v385_v31 = vadd.f32 %v596_v14, %v384_v29  ;;  %424 = sbr.rel (!%p923_p9) target bundleno = 291 (0x123), region = 40 }
 0x117   : > { %v678_v32 = vpop.f32.mrf.mxu1 }
 0x118   : > { %v636_v33 = vpack.c.bf16 %v385_v31, %v382_v30 }
 0x119   : > { %v446_v34 = vld [vmem:[%s224_s12] sm:$0xf] (%p923_p9)  ;;  %v448_v35 = vld [vmem:[%s224_s12 + $0x4] sm:$0xf] (%p923_p9)  ;;  %v450_v36 = vld [vmem:[%s224_s12 + $0x8] sm:$0xf] (%p923_p9) }
 0x11a   : > { %639 = vst [vmem:[%s224_s12 + $0x10] sm:$0xff] %v636_v33   ;;  %v452_v37 = vld [vmem:[%s224_s12 + $0xc] sm:$0xf] (%p923_p9)  ;;  %447 = vst [vmem:[%s429_s22] sm:$0xf] (%p923_p9), %v446_v34 }
 0x11b   : > { %449 = vst [vmem:[%s429_s22 + $0xc] sm:$0xf] %v448_v35  ;;  %451 = vst [vmem:[%s429_s22 + $0x18] sm:$0xf] %v450_v36 }
 0x11c   : > { %453 = vst [vmem:[%s429_s22 + $0x24] sm:$0xf] %v452_v37 }
 0x121   : > { %v454_v38 = vld [vmem:[%s224_s12 + $0x10] sm:$0xf]  ;;  %v456_v39 = vld [vmem:[%s224_s12 + $0x14] sm:$0xf] }
 0x122   : > { %455 = vst [vmem:[%s429_s22 + $0x30] sm:$0xf] %v454_v38  ;;  %457 = vst [vmem:[%s429_s22 + $0x3c] sm:$0xf] %v456_v39 }
 0x123 PF: > { %s16_s17 = sadd.s32 1, %s845_s17   ;;  %s1016_s12 = smov %s829_s13 }
 0x124   : > { %p13_p9 = scmp.ge.s32.totalorder %s16_s17, 5   ;;  %s1017_s13 = smov %s833_s14 }
 0x125   : > { %s1018_s14 = smov %s921_s24  ;;  %s1019_s15 = smov %s841_s16 }
 0x126   : > { %s1020_s16 = smov %s1022_s19  ;;  %15 = sbr.rel (!%p13_p9) target bundleno = 4 (0x4), region = 119 }
 0x12b   :  { %503 = vsyncpa [#allocation3], 1 }
 0x12c   :  { %505 = vsyncpa [#allocation3 + $0x1], 1 }

// kernel: gpt_head_forward.17
= control target key start
LH: loop header
LB: loop body
LE: loop exit
PB: predicated region body
PF: predicated region fallthrough
CT: control target
= control target key end

     0   :  { %8 = vsyncpa [#allocation3], 0  ;;  %s230_s12 = smov [#allocation2]   ;;  %s271_s0 = inlined_call_operand.hbm [shape: f32[48,128], index: 0, kind: input, shape index: {}]   ;;  %s272_s1 = inlined_call_operand.vmem [shape: f32[1,128], index: 1, kind: input, shape index: {}]   ;;  %s273_s2 = inlined_call_operand.vmem [shape: f32[1,128], index: 2, kind: input, shape index: {}]   ;;  %s274_s3 = inlined_call_operand.vmem [shape: bf16[48,128], index: 3, kind: output, shape index: {}]  }
   0x1   :  { %s14_s13 = sshll.u32 %s230_s12, 4  ;;  %s15_s13 = int_to_ptr.vmem [resolvable:$true] %s14_s13 }
   0x2   :  { %s216_s14 = scalar_lea.vmem %s15_s13, 768  ;;  %p221_p1 = scmp.lt.s32.totalorder %s15_s13, %s15_s13 }
   0x3   :  { %p217_p0 = scmp.ne.s32.totalorder %s15_s13, %s216_s14  ;;  %p222_p2 = scmp.lt.s32.totalorder %s216_s14, %s216_s14 }
   0x5   :  { %p223_p3 = por %p222_p2, %p221_p1 }
   0x7   :  { %p224_p4 = pnand %p223_p3, %p217_p0 }
   0x9   :  { %227 = shalt.err (!%p224_p4)
}
   0xa   :  { %s231_s15 = smov 128   ;;  %s232_s16 = smov 8  }
   0xb   :  { %20 = dma.hbm_to_vmem [thread:$0]  %s271_s0, 768, %s15_s13, [#allocation3], %s231_s15, %s231_s15, %s232_s16  }
   0xc   :  { %228 = dma.done.wait [#allocation3], 768  }
   0xd   :  { %229 = vsyncadd [#allocation3], 4294966528  ;;  %v28_v0 = vld [vmem:[#allocation2] sm:$0xff]  ;;  %v30_v1 = vld [vmem:[#allocation2 + $0x10] sm:$0xff] }
   0xe   :  { %34 = vadd.xlane.f32.xlu0 %v28_v0  ;;  %38 = vadd.xlane.f32.xlu1 %v30_v1  ;;  %v29_v2 = vld [vmem:[#allocation2 + $0x8] sm:$0xff]  ;;  %v31_v3 = vld [vmem:[#allocation2 + $0x18] sm:$0xff]  ;;  %v32_v4 = vld [vmem:[#allocation2 + $0x20] sm:$0xff] }
   0xf   :  { %v33_v5 = vld [vmem:[#allocation2 + $0x28] sm:$0xff]  ;;  %v162_v50 = vld [vmem:[%s272_s1] ss:$0 sm:$0xff] }
  0x10   :  { %v163_v55 = vld [vmem:[%s273_s2] ss:$0 sm:$0xff] }
  0x12   :  { %36 = vadd.xlane.f32.xlu0 %v29_v2  ;;  %40 = vadd.xlane.f32.xlu1 %v31_v3 }
  0x16   :  { %42 = vadd.xlane.f32.xlu0 %v32_v4  ;;  %44 = vadd.xlane.f32.xlu1 %v33_v5 }
  0x97   :  { %v35_v6 = vpop.xlane.xlu0 %34  ;;  %v39_v7 = vpop.xlane.xlu1 %38 }
  0x98   :  { %v47_v8 = vmul.f32 0.0078125, %v35_v6  ;;  %v49_v9 = vmul.f32 0.0078125, %v39_v7 }
  0x9a   :  { %v53_v10 = vsub.f32 %v28_v0, %v47_v8  ;;  %v55_v11 = vsub.f32 %v30_v1, %v49_v9 }
  0x9b   :  { %v37_v12 = vpop.xlane.xlu0 %36  ;;  %v41_v13 = vpop.xlane.xlu1 %40 }
  0x9c   :  { %v48_v14 = vmul.f32 0.0078125, %v37_v12  ;;  %v59_v15 = vmul.f32 %v53_v10, %v53_v10  ;;  %v50_v16 = vmul.f32 0.0078125, %v41_v13  ;;  %v61_v19 = vmul.f32 %v55_v11, %v55_v11 }
  0x9e   :  { %v54_v17 = vsub.f32 %v29_v2, %v48_v14  ;;  %65 = vadd.xlane.f32.xlu0 %v59_v15  ;;  %v56_v18 = vsub.f32 %v31_v3, %v50_v16 }
  0x9f   :  { %v43_v20 = vpop.xlane.xlu0 %42  ;;  %v45_v21 = vpop.xlane.xlu1 %44 }
  0xa0   :  { %v51_v22 = vmul.f32 0.0078125, %v43_v20  ;;  %v60_v23 = vmul.f32 %v54_v17, %v54_v17  ;;  %v52_v24 = vmul.f32 0.0078125, %v45_v21  ;;  %v62_v27 = vmul.f32 %v56_v18, %v56_v18 }
  0xa2   :  { %v57_v25 = vsub.f32 %v32_v4, %v51_v22  ;;  %69 = vadd.xlane.f32.xlu0 %v61_v19  ;;  %67 = vadd.xlane.f32.xlu1 %v60_v23  ;;  %v58_v26 = vsub.f32 %v33_v5, %v52_v24 }
  0xa4   :  { %v63_v28 = vmul.f32 %v57_v25, %v57_v25  ;;  %v64_v29 = vmul.f32 %v58_v26, %v58_v26 }
  0xa6   :  { %71 = vadd.xlane.f32.xlu1 %v62_v27  ;;  %73 = vadd.xlane.f32.xlu0 %v63_v28 }
  0xaa   :  { %75 = vadd.xlane.f32.xlu1 %v64_v29 }
 0x127   :  { %v66_v30 = vpop.xlane.xlu0 %65 }
 0x128   :  { %v77_v31 = vmul.f32 0.0078125, %v66_v30 }
 0x12a   :  { %v83_v32 = vadd.f32 1e-05, %v77_v31 }
 0x12b   :  { %v68_v33 = vpop.xlane.xlu1 %67  ;;  %v70_v34 = vpop.xlane.xlu0 %69 }
 0x12c   :  { %196 = vrsqrt.f32 %v83_v32  ;;  %v78_v35 = vmul.f32 0.0078125, %v68_v33  ;;  %v79_v36 = vmul.f32 0.0078125, %v70_v34 }
 0x12e   :  { %v84_v37 = vadd.f32 1e-05, %v78_v35  ;;  %v85_v38 = vadd.f32 1e-05, %v79_v36 }
 0x12f   :  { %v72_v39 = vpop.xlane.xlu1 %71  ;;  %v74_v40 = vpop.xlane.xlu0 %73 }
 0x130   :  { %198 = vrsqrt.f32 %v84_v37  ;;  %v80_v41 = vmul.f32 0.0078125, %v72_v39  ;;  %v81_v42 = vmul.f32 0.0078125, %v74_v40 }
 0x131   :  { %200 = vrsqrt.f32 %v85_v38 }
 0x132   :  { %v86_v43 = vadd.f32 1e-05, %v80_v41  ;;  %v87_v44 = vadd.f32 1e-05, %v81_v42 }
 0x133   :  { %v76_v45 = vpop.xlane.xlu1 %75 }
 0x134   :  { %202 = vrsqrt.f32 %v86_v43  ;;  %v82_v46 = vmul.f32 0.0078125, %v76_v45 }
 0x135   :  { %204 = vrsqrt.f32 %v87_v44 }
 0x136   :  { %v88_v47 = vadd.f32 1e-05, %v82_v46 }
 0x138   :  { %206 = vrsqrt.f32 %v88_v47 }
 0x139   :  { %v197_v48 = vpop.eup %196 }
 0x13a   :  { %v95_v49 = vmul.f32 %v197_v48, %v53_v10 }
 0x13c   :  { %v108_v53 = vmul.f32 %v162_v50, %v95_v49 }
 0x13d   :  { %v199_v51 = vpop.eup %198 }
 0x13e   :  { %v201_v52 = vpop.eup %200  ;;  %v96_v54 = vmul.f32 %v199_v51, %v54_v17  ;;  %v121_v60 = vadd.f32 %v163_v55, %v108_v53 }
 0x13f   :  { %v97_v56 = vmul.f32 %v201_v52, %v55_v11 }
 0x140   :  { %v109_v57 = vmul.f32 %v162_v50, %v96_v54 }
 0x141   :  { %v203_v58 = vpop.eup %202  ;;  %v110_v62 = vmul.f32 %v162_v50, %v97_v56 }
 0x142   :  { %v205_v59 = vpop.eup %204  ;;  %v122_v61 = vadd.f32 %v163_v55, %v109_v57  ;;  %v98_v63 = vmul.f32 %v203_v58, %v56_v18 }
 0x143   :  { %v99_v0 = vmul.f32 %v205_v59, %v57_v25  ;;  %v123_v4 = vadd.f32 %v163_v55, %v110_v62 }
 0x144   :  { %v179_v1 = vpack.c.bf16 %v122_v61, %v121_v60  ;;  %v111_v2 = vmul.f32 %v162_v50, %v98_v63 }
 0x145   :  { %v207_v3 = vpop.eup %206  ;;  %v112_v6 = vmul.f32 %v162_v50, %v99_v0 }
 0x146   :  { %180 = vst [vmem:[%s274_s3] sm:$0xff] %v179_v1   ;;  %v124_v5 = vadd.f32 %v163_v55, %v111_v2  ;;  %v100_v7 = vmul.f32 %v207_v3, %v58_v26 }
 0x147   :  { %v125_v10 = vadd.f32 %v163_v55, %v112_v6 }
 0x148   :  { %v184_v8 = vpack.c.bf16 %v124_v5, %v123_v4  ;;  %v113_v9 = vmul.f32 %v162_v50, %v100_v7 }
 0x14a   :  { %191 = vst [vmem:[%s274_s3 + $0x8] sm:$0xff] %v184_v8   ;;  %v126_v11 = vadd.f32 %v163_v55, %v113_v9 }
 0x14c   :  { %v189_v12 = vpack.c.bf16 %v126_v11, %v125_v10 }
 0x14e   :  { %192 = vst [vmem:[%s274_s3 + $0x10] sm:$0xff] %v189_v12  }
 0x14f   :  { %161 = vsyncpa [#allocation3], 1 }

// kernel: gpt_head_forward.21
= control target key start
LH: loop header
LB: loop body
LE: loop exit
PB: predicated region body
PF: predicated region fallthrough
CT: control target
= control target key end

     0   :  { %s243_s0 = inlined_call_operand.vmem [shape: f32[48,128], index: 0, kind: input, shape index: {}]   ;;  %s244_s1 = inlined_call_operand.vmem [shape: f32[1,128], index: 1, kind: input, shape index: {}]   ;;  %s245_s2 = inlined_call_operand.vmem [shape: f32[1,128], index: 2, kind: input, shape index: {}]   ;;  %s246_s3 = inlined_call_operand.vmem [shape: bf16[48,128], index: 3, kind: output, shape index: {}]  }
   0x1   :  { %v14_v0 = vld [vmem:[%s243_s0] sm:$0xff]  ;;  %v16_v1 = vld [vmem:[%s243_s0 + $0x10] sm:$0xff]  ;;  %v15_v2 = vld [vmem:[%s243_s0 + $0x8] sm:$0xff] }
   0x2   :  { %20 = vadd.xlane.f32.xlu0 %v14_v0  ;;  %24 = vadd.xlane.f32.xlu1 %v16_v1  ;;  %v17_v3 = vld [vmem:[%s243_s0 + $0x18] sm:$0xff]  ;;  %v18_v4 = vld [vmem:[%s243_s0 + $0x20] sm:$0xff]  ;;  %v19_v5 = vld [vmem:[%s243_s0 + $0x28] sm:$0xff] }
   0x3   :  { %v147_v50 = vld [vmem:[%s244_s1] ss:$0 sm:$0xff] }
   0x4   :  { %v148_v55 = vld [vmem:[%s245_s2] ss:$0 sm:$0xff] }
   0x6   :  { %22 = vadd.xlane.f32.xlu0 %v15_v2  ;;  %26 = vadd.xlane.f32.xlu1 %v17_v3 }
   0xa   :  { %28 = vadd.xlane.f32.xlu0 %v18_v4  ;;  %30 = vadd.xlane.f32.xlu1 %v19_v5 }
  0x8b   :  { %v21_v6 = vpop.xlane.xlu0 %20  ;;  %v25_v7 = vpop.xlane.xlu1 %24 }
  0x8c   :  { %v33_v8 = vmul.f32 0.0078125, %v21_v6  ;;  %v35_v9 = vmul.f32 0.0078125, %v25_v7 }
  0x8e   :  { %v39_v10 = vsub.f32 %v14_v0, %v33_v8  ;;  %v41_v11 = vsub.f32 %v16_v1, %v35_v9 }
  0x8f   :  { %v23_v12 = vpop.xlane.xlu0 %22  ;;  %v27_v13 = vpop.xlane.xlu1 %26 }
  0x90   :  { %v34_v14 = vmul.f32 0.0078125, %v23_v12  ;;  %v45_v15 = vmul.f32 %v39_v10, %v39_v10  ;;  %v36_v16 = vmul.f32 0.0078125, %v27_v13  ;;  %v47_v19 = vmul.f32 %v41_v11, %v41_v11 }
  0x92   :  { %v40_v17 = vsub.f32 %v15_v2, %v34_v14  ;;  %51 = vadd.xlane.f32.xlu0 %v45_v15  ;;  %v42_v18 = vsub.f32 %v17_v3, %v36_v16 }
  0x93   :  { %v29_v20 = vpop.xlane.xlu0 %28  ;;  %v31_v21 = vpop.xlane.xlu1 %30 }
  0x94   :  { %v37_v22 = vmul.f32 0.0078125, %v29_v20  ;;  %v46_v23 = vmul.f32 %v40_v17, %v40_v17  ;;  %v38_v24 = vmul.f32 0.0078125, %v31_v21  ;;  %v48_v27 = vmul.f32 %v42_v18, %v42_v18 }
  0x96   :  { %v43_v25 = vsub.f32 %v18_v4, %v37_v22  ;;  %55 = vadd.xlane.f32.xlu0 %v47_v19  ;;  %53 = vadd.xlane.f32.xlu1 %v46_v23  ;;  %v44_v26 = vsub.f32 %v19_v5, %v38_v24 }
  0x98   :  { %v49_v28 = vmul.f32 %v43_v25, %v43_v25  ;;  %v50_v29 = vmul.f32 %v44_v26, %v44_v26 }
  0x9a   :  { %57 = vadd.xlane.f32.xlu1 %v48_v27  ;;  %59 = vadd.xlane.f32.xlu0 %v49_v28 }
  0x9e   :  { %61 = vadd.xlane.f32.xlu1 %v50_v29 }
 0x11b   :  { %v52_v30 = vpop.xlane.xlu0 %51 }
 0x11c   :  { %v63_v31 = vmul.f32 0.0078125, %v52_v30 }
 0x11e   :  { %v69_v32 = vadd.f32 1e-05, %v63_v31 }
 0x11f   :  { %v54_v33 = vpop.xlane.xlu1 %53  ;;  %v56_v34 = vpop.xlane.xlu0 %55 }
 0x120   :  { %178 = vrsqrt.f32 %v69_v32  ;;  %v64_v35 = vmul.f32 0.0078125, %v54_v33  ;;  %v65_v36 = vmul.f32 0.0078125, %v56_v34 }
 0x122   :  { %v70_v37 = vadd.f32 1e-05, %v64_v35  ;;  %v71_v38 = vadd.f32 1e-05, %v65_v36 }
 0x123   :  { %v58_v39 = vpop.xlane.xlu1 %57  ;;  %v60_v40 = vpop.xlane.xlu0 %59 }
 0x124   :  { %180 = vrsqrt.f32 %v70_v37  ;;  %v66_v41 = vmul.f32 0.0078125, %v58_v39  ;;  %v67_v42 = vmul.f32 0.0078125, %v60_v40 }
 0x125   :  { %182 = vrsqrt.f32 %v71_v38 }
 0x126   :  { %v72_v43 = vadd.f32 1e-05, %v66_v41  ;;  %v73_v44 = vadd.f32 1e-05, %v67_v42 }
 0x127   :  { %v62_v45 = vpop.xlane.xlu1 %61 }
 0x128   :  { %184 = vrsqrt.f32 %v72_v43  ;;  %v68_v46 = vmul.f32 0.0078125, %v62_v45 }
 0x129   :  { %186 = vrsqrt.f32 %v73_v44 }
 0x12a   :  { %v74_v47 = vadd.f32 1e-05, %v68_v46 }
 0x12c   :  { %188 = vrsqrt.f32 %v74_v47 }
 0x12d   :  { %v179_v48 = vpop.eup %178 }
 0x12e   :  { %v81_v49 = vmul.f32 %v179_v48, %v39_v10 }
 0x130   :  { %v94_v53 = vmul.f32 %v147_v50, %v81_v49 }
 0x131   :  { %v181_v51 = vpop.eup %180 }
 0x132   :  { %v183_v52 = vpop.eup %182  ;;  %v82_v54 = vmul.f32 %v181_v51, %v40_v17  ;;  %v107_v60 = vadd.f32 %v148_v55, %v94_v53 }
 0x133   :  { %v83_v56 = vmul.f32 %v183_v52, %v41_v11 }
 0x134   :  { %v95_v57 = vmul.f32 %v147_v50, %v82_v54 }
 0x135   :  { %v185_v58 = vpop.eup %184  ;;  %v96_v62 = vmul.f32 %v147_v50, %v83_v56 }
 0x136   :  { %v187_v59 = vpop.eup %186  ;;  %v108_v61 = vadd.f32 %v148_v55, %v95_v57  ;;  %v84_v63 = vmul.f32 %v185_v58, %v42_v18 }
 0x137   :  { %v85_v0 = vmul.f32 %v187_v59, %v43_v25  ;;  %v109_v4 = vadd.f32 %v148_v55, %v96_v62 }
 0x138   :  { %v164_v1 = vpack.c.bf16 %v108_v61, %v107_v60  ;;  %v97_v2 = vmul.f32 %v147_v50, %v84_v63 }
 0x139   :  { %v189_v3 = vpop.eup %188  ;;  %v98_v6 = vmul.f32 %v147_v50, %v85_v0 }
 0x13a   :  { %165 = vst [vmem:[%s246_s3] sm:$0xff] %v164_v1   ;;  %v110_v5 = vadd.f32 %v148_v55, %v97_v2  ;;  %v86_v7 = vmul.f32 %v189_v3, %v44_v26 }
 0x13b   :  { %v111_v10 = vadd.f32 %v148_v55, %v98_v6 }
 0x13c   :  { %v169_v8 = vpack.c.bf16 %v110_v5, %v109_v4  ;;  %v99_v9 = vmul.f32 %v147_v50, %v86_v7 }
 0x13e   :  { %176 = vst [vmem:[%s246_s3 + $0x8] sm:$0xff] %v169_v8   ;;  %v112_v11 = vadd.f32 %v148_v55, %v99_v9 }
 0x140   :  { %v174_v12 = vpack.c.bf16 %v112_v11, %v111_v10 }
 0x142   :  { %177 = vst [vmem:[%s246_s3 + $0x10] sm:$0xff] %v174_v12  }

// kernel: gpt_head_forward.19
= control target key start
LH: loop header
LB: loop body
LE: loop exit
PB: predicated region body
PF: predicated region fallthrough
CT: control target
= control target key end

     0   :  { %s856_s12 = smov 0   ;;  %s858_s13 = smov 0   ;;  %s927_s0 = inlined_call_operand.vmem [shape: bf16[2,4,24,32], index: 0, kind: input, shape index: {}]   ;;  %s928_s1 = inlined_call_operand.vmem [shape: bf16[2,4,24,32], index: 1, kind: input, shape index: {}]   ;;  %s929_s2 = inlined_call_operand.vmem [shape: bf16[2,4,24,32], index: 2, kind: input, shape index: {}]   ;;  %s930_s3 = inlined_call_operand.vmem [shape: bf16[2,4,24,32], index: 3, kind: output, shape index: {}]  }
   0x1   :  { %s860_s14 = smov 0   ;;  %s862_s15 = smov 0  }
   0x2   :  { %s864_s16 = smov 0  }
   0x3 LB: > { %s22_s17 = sadd.s32 1, %s826_s14  ;;  %s25_s18 = sadd.s32 1, %s830_s15  ;;  %s834_s16 = sphi %s864_s16, %s13_s16   ;;  %s830_s15 = sphi %s862_s15, %s934_s15   ;;  %s826_s14 = sphi %s860_s14, %s933_s14   ;;  %s822_s13 = sphi %s858_s13, %s932_s13   ;;  %s818_s12 = sphi %s856_s12, %s931_s12  }
   0x4   : > { %p23_p0 = scmp.ge.s32.totalorder %s22_s17, 4  ;;  %p686_p1 = scmp.ge.s32.totalorder %s834_s16, 1 }
   0x5   : > { %p189_p2 = scmp.lt.s32.totalorder %s834_s16, 9 }
   0x6   : > { %s936_s17 = smov (%p23_p0, %s22_s17), 0  ;;  %s938_s18 = smov (!%p23_p0, %s25_s18), %s830_s15 }
   0x7   : > { %p190_p3 = pnand %p686_p1, %p189_p2  ;;  %p27_p4 = scmp.ge.s32.totalorder %s938_s18, 2 }
   0x8   : > { %p239_p5 = scmp.lt.s32.totalorder (!%p190_p3), %s822_s13, 1  ;;  %p241_p6 = scmp.lt.s32.totalorder (!%p190_p3), %s818_s12, 3 }
   0x9   : > { %s940_s18 = smov (%p27_p4, %s938_s18), 0  ;;  %193 = sbr.rel (%p190_p3) target bundleno = 758 (0x2f6), region = 32 }
   0xe   : > { %s942_s13 = smov (!%p239_p5, %s822_s13), 1  ;;  %s944_s12 = smov (!%p241_p6, %s818_s12), 3  ;;  %vm301_vm0 = vcmask 261120   ;;  %v365_v6 = vlaneseq  ;;  %vm425_vm2 = vcmask 195584   ;;  %vm476_vm5 = vcmask 1043456  }
   0xf   : > { %s737_s19 = smul.u32 12, %s942_s13  ;;  %vm541_vm6 = vcmask 257024  }
  0x10   : > { %s736_s20 = smul.u32 3, %s944_s12  ;;  %v366_v7 = vshrl.u32 %v365_v6, 7  ;;  %v406_v9 = vand.u32 127, %v365_v6 }
  0x12   : > { %s245_s21 = sadd.s32 %s737_s19, %s736_s20  ;;  %v368_v8 = vadd.s32 16, %v366_v7  ;;  %v411_v11 = vand.u32 7, %v406_v9  ;;  %v373_v12 = vand.u32 7, %v366_v7  ;;  %v367_v13 = vadd.s32 8, %v366_v7 }
  0x13   : > { %s886_s22 = sshll.u32 %s245_s21, 2 }
  0x14   : > { %s256_s25 = scalar_lea.vmem %s928_s1, %s886_s22  ;;  %s247_s28 = scalar_lea.vmem %s927_s0, %s886_s22  ;;  %v387_v10 = vand.u32 7, %v368_v8  ;;  %vm419_vm3 = vcmp.le.s32.totalorder %v411_v11, %v373_v12  ;;  %v380_v17 = vand.u32 7, %v367_v13 }
  0x15   : > { %v778_v0 = vld [vmem:[%s256_s25] sm:$0xff]   ;;  %v779_v1 = vld [vmem:[%s256_s25 + $0x8] ss:$0 sps:$4 sm:$0xff]   ;;  %s265_s4 = scalar_lea.vmem %s929_s2, %s886_s22  ;;  %s274_s7 = scalar_lea.vmem %s930_s3, %s886_s22 }
  0x16   : > { %v780_v2 = vld [vmem:[%s247_s28] sm:$0xff]   ;;  %733 = vmatprep.subr.msk.bf16.mxu0 %vm301_vm0, %v779_v1  ;;  %v312_v3 = vsel %vm301_vm0, %v779_v1, 0  ;;  %v309_v4 = vsel %vm301_vm0, %v778_v0, 0  ;;  %v781_v5 = vld [vmem:[%s247_s28 + $0x8] ss:$0 sps:$4 sm:$0xff]   ;;  %vm421_vm1 = vcmp.le.s32.totalorder %v411_v11, %v387_v10  ;;  %vm420_vm4 = vcmp.le.s32.totalorder %v411_v11, %v380_v17 }
  0x17   : > { %718 = vmatpush3.bf16.xpose.msra.mxu0 %v312_v3  ;;  %721 = vmatprep.mubr.msk.bf16.mxu0 %vm301_vm0, %v780_v2  ;;  %v782_v43 = vld [vmem:[%s265_s4 + $0x8] ss:$0 sps:$4 sm:$0xff]   ;;  %v783_v44 = vld [vmem:[%s265_s4] sm:$0xff]  }
  0x18   : > { %734 = vmatprep.subr.msk.bf16.mxu0 %vm301_vm0, %v778_v0  ;;  %735 = vmatprep.subr.msk.bf16.mxu1 %vm476_vm5, %v782_v43  ;;  %v478_v45 = vsel %vm476_vm5, %v782_v43, 0 }
  0x19   : > { %726 = vmatpush3.bf16.msra.mxu1 %v478_v45 }
  0x1a   : > { %727 = vmatprep.subr.bf16.mxu1 %v783_v44 }
  0x1d   : > { %728 = vmatpush3.bf16.msra.mxu1 %v783_v44 }
  0x1f   : > { %720 = vmatpush3.bf16.xpose.msra.mxu0 %v309_v4 }
  0x26   : > { %722 = vmatmul.mubr.msk.bf16.vlgmr.msra.gmra.mxu0 %vm301_vm0, %v781_v5 }
  0xe6   : > { %v723_v14 = vpop.f32.mrf.mxu0 }
  0xe7   : > { %v364_v15 = vmul.f32 0.17677669, %v723_v14 }
  0xe8   : > { %v348_v16 = vpop.f32.mrf.mxu0 }
  0xe9   : > { %v362_v18 = vmul.f32 0.17677669, %v348_v16  ;;  %v424_v19 = vsel %vm421_vm1, %v364_v15, -1e+30 }
  0xea   : > { %v724_v20 = vpop.f32.mrf.mxu0  ;;  %v432_v21 = vsel %vm425_vm2, %v424_v19, -inf }
  0xeb   : > { %433 = vmax.xlane.f32.xlu1 %v432_v21  ;;  %v422_v22 = vsel %vm419_vm3, %v362_v18, -1e+30 }
  0xec   : > { %v351_v23 = vpop.f32.mrf.mxu0  ;;  %v426_v24 = vsel %vm425_vm2, %v422_v22, -inf }
  0xed   : > { %v363_v25 = vmul.f32 0.17677669, %v351_v23  ;;  %427 = vmax.xlane.f32.xlu0 %v426_v24 }
  0xef   : > { %v423_v26 = vsel %vm420_vm4, %v363_v25, -1e+30 }
  0xf0   : > { %v429_v27 = vsel %vm425_vm2, %v423_v26, -inf }
  0xf1   : > { %430 = vmax.xlane.f32.xlu0 %v429_v27 }
 0x174   : > { %v434_v28 = vpop.xlane.xlu1 %433 }
 0x175   : > { %v437_v29 = vsub.f32 %v424_v19, %v434_v28 }
 0x176   : > { %v428_v30 = vpop.xlane.xlu0 %427 }
 0x177   : > { %v435_v31 = vsub.f32 %v422_v22, %v428_v30  ;;  %v442_v32 = vmul.f32 1.442695, %v437_v29 }
 0x179   : > { %v438_v33 = vmul.f32 1.442695, %v435_v31 }
 0x17a   : > { %v431_v34 = vpop.xlane.xlu0 %430 }
 0x17b   : > { %784 = vpow2.f32 %v438_v33  ;;  %v436_v35 = vsub.f32 %v423_v26, %v431_v34 }
 0x17c   : > { %786 = vpow2.f32 %v442_v32 }
 0x17d   : > { %v440_v36 = vmul.f32 1.442695, %v436_v35 }
 0x17f   : > { %788 = vpow2.f32 %v440_v36 }
 0x188   : > { %v785_v37 = vpop.eup %784 }
 0x189   : > { %v444_v38 = vsel %vm425_vm2, %v785_v37, 0.0  ;;  %v787_v39 = vpop.eup %786 }
 0x18a   : > { %445 = vadd.xlane.f32.xlu1 %v444_v38  ;;  %v450_v41 = vsel %vm425_vm2, %v787_v39, 0.0 }
 0x18c   : > { %v789_v40 = vpop.eup %788 }
 0x18d   : > { %v447_v42 = vsel %vm425_vm2, %v789_v40, 0.0 }
 0x18e   : > { %451 = vadd.xlane.f32.xlu1 %v450_v41  ;;  %448 = vadd.xlane.f32.xlu0 %v447_v42 }
 0x213   : > { %v446_v46 = vpop.xlane.xlu1 %445 }
 0x214   : > { %790 = vrcp.f32 %v446_v46 }
 0x217   : > { %v452_v47 = vpop.xlane.xlu1 %451  ;;  %v449_v48 = vpop.xlane.xlu0 %448 }
 0x218   : > { %792 = vrcp.f32 %v452_v47 }
 0x219   : > { %794 = vrcp.f32 %v449_v48 }
 0x221   : > { %v791_v49 = vpop.eup %790 }
 0x222   : > { %v454_v53 = vmul.f32 %v791_v49, %v785_v37 }
 0x225   : > { %v793_v50 = vpop.eup %792 }
 0x226   : > { %v795_v51 = vpop.eup %794  ;;  %v458_v52 = vmul.f32 %v793_v50, %v787_v39 }
 0x227   : > { %v456_v54 = vmul.f32 %v795_v51, %v789_v40 }
 0x228   : > { %v460_v55 = vpack.c.bf16 %v458_v52, %v458_v52 }
 0x229   : > { %v459_v56 = vpack.c.bf16 %v456_v54, %v454_v53 }
 0x22b   : > { %729 = vmatprep.mubr.msk.bf16.mxu1 %vm425_vm2, %v459_v56 }
 0x22c   : > { %730 = vmatmul.mubr.msk.bf16.vlgmr.msra.gmra.mxu1 %vm425_vm2, %v460_v55 }
 0x2ec   : > { %v731_v57 = vpop.f32.mrf.mxu1 }
 0x2ed   : > { %v708_v58 = vpack.c.bf16 %v731_v57, %v731_v57 }
 0x2ee   : > { %v514_v59 = vpop.f32.mrf.mxu1 }
 0x2ef   : > { %544 = vst.msk [vmem:[%s274_s7 + $0x8] sm:$0xf] %vm541_vm6, %v708_v58  ;;  %v706_v60 = vpack.c.bf16 %v514_v59, %v514_v59 }
 0x2f0   : > { %v732_v61 = vpop.f32.mrf.mxu1 }
 0x2f1   : > { %542 = vst.msk [vmem:[%s274_s7] sm:$0xf] %vm541_vm6, %v706_v60 }
 0x2f2   : > { %v517_v62 = vpop.f32.mrf.mxu1 }
 0x2f3   : > { %v707_v63 = vpack.c.bf16 %v517_v62, %v517_v62 }
 0x2f5   : > { %543 = vst.msk [vmem:[%s274_s7 + $0x4] sm:$0xf] %vm541_vm6, %v707_v63 }
 0x2f6 PF: > { %s13_s16 = sadd.s32 1, %s834_s16   ;;  %s931_s12 = smov %s826_s14 }
 0x2f7   : > { %p10_p7 = scmp.ge.s32.totalorder %s13_s16, 10   ;;  %s932_s13 = smov %s830_s15 }
 0x2f8   : > { %s933_s14 = smov %s936_s17  ;;  %s934_s15 = smov %s940_s18 }
 0x2f9   :  { %12 = sbr.rel (!%p10_p7) target bundleno = 3 (0x3), region = 68 }

// kernel: gpt_head_forward.20
= control target key start
LH: loop header
LB: loop body
LE: loop exit
PB: predicated region body
PF: predicated region fallthrough
CT: control target
= control target key end

     0   :  { %v272_v0 = vmov 0.0   ;;  %vm273_vm0 = vmmov 0   ;;  %s374_s1 = inlined_call_operand.vmem [shape: bf16[128,128], index: 1, kind: input, shape index: {}]   ;;  %s375_s0 = inlined_call_operand.vmem [shape: bf16[48,128], index: 0, kind: input, shape index: {}]   ;;  %s376_s2 = inlined_call_operand.vmem [shape: f32[1,128], index: 2, kind: input, shape index: {}]   ;;  %s377_s3 = inlined_call_operand.vmem [shape: f32[48,128], index: 3, kind: input, shape index: {}]   ;;  %s378_s4 = inlined_call_operand.vmem [shape: f32[48,128], index: 4, kind: output, shape index: {}]  }
   0x1   :  { %243 = vmatprep.subr.bf16.mxu1 %v272_v0  ;;  %v261_v1 = vld [vmem:[%s374_s1 + $0x38] sm:$0xff]   ;;  %215 = vmatprep.subr.bf16.mxu0 %v272_v0  ;;  %v262_v2 = vld [vmem:[%s374_s1 + $0x30] sm:$0xff]   ;;  %v263_v3 = vld [vmem:[%s374_s1 + $0x28] sm:$0xff]  }
   0x2   :  { %235 = vmatprep.mubr.msk.bf16.mxu1 %vm273_vm0, %v272_v0  ;;  %231 = vmatprep.mubr.msk.bf16.mxu0 %vm273_vm0, %v272_v0  ;;  %v264_v4 = vld [vmem:[%s374_s1 + $0x20] sm:$0xff]   ;;  %v265_v5 = vld [vmem:[%s374_s1 + $0x18] sm:$0xff]   ;;  %v266_v6 = vld [vmem:[%s374_s1 + $0x10] sm:$0xff]  }
   0x3   :  { %251 = vmatpush3.bf16.msra.mxu1 %v261_v1  ;;  %216 = vmatpush3.bf16.msra.mxu0 %v261_v1  ;;  %v267_v7 = vld [vmem:[%s374_s1 + $0x8] sm:$0xff]   ;;  %v268_v8 = vld [vmem:[%s374_s1] sm:$0xff]   ;;  %v271_v11 = vld [vmem:[%s375_s0 + $0x10] sm:$0xff]  }
   0x4   :  { %244 = vmatprep.subr.bf16.mxu1 %v272_v0  ;;  %217 = vmatprep.subr.bf16.mxu0 %v272_v0  ;;  %v269_v9 = vld [vmem:[%s375_s0 + $0x8] sm:$0xff]   ;;  %v270_v10 = vld [vmem:[%s375_s0] sm:$0xff]   ;;  %v172_v14 = vld [vmem:[%s377_s3 + $0x10] sm:$0xff] }
   0x5   :  { %v192_v12 = vld [vmem:[%s376_s2] ss:$0 sm:$0xff]  ;;  %v173_v24 = vld [vmem:[%s377_s3 + $0x18] sm:$0xff]  ;;  %v171_v26 = vld [vmem:[%s377_s3 + $0x8] sm:$0xff] }
   0x6   :  { %v170_v16 = vld [vmem:[%s377_s3] sm:$0xff]  ;;  %v175_v39 = vld [vmem:[%s377_s3 + $0x28] sm:$0xff] }
   0x7   :  { %252 = vmatpush3.bf16.msra.mxu1 %v262_v2  ;;  %218 = vmatpush3.bf16.msra.mxu0 %v262_v2  ;;  %v174_v34 = vld [vmem:[%s377_s3 + $0x20] sm:$0xff] }
   0x8   :  { %245 = vmatprep.subr.bf16.mxu1 %v272_v0  ;;  %219 = vmatprep.subr.bf16.mxu0 %v272_v0 }
   0xb   :  { %253 = vmatpush3.bf16.msra.mxu1 %v263_v3  ;;  %220 = vmatpush3.bf16.msra.mxu0 %v263_v3 }
   0xc   :  { %246 = vmatprep.subr.bf16.mxu1 %v272_v0  ;;  %221 = vmatprep.subr.bf16.mxu0 %v272_v0 }
   0xf   :  { %254 = vmatpush3.bf16.msra.mxu1 %v264_v4  ;;  %222 = vmatpush3.bf16.msra.mxu0 %v264_v4 }
  0x10   :  { %247 = vmatprep.subr.bf16.mxu1 %v272_v0  ;;  %223 = vmatprep.subr.bf16.mxu0 %v272_v0 }
  0x13   :  { %255 = vmatpush3.bf16.msra.mxu1 %v265_v5  ;;  %224 = vmatpush3.bf16.msra.mxu0 %v265_v5 }
  0x14   :  { %248 = vmatprep.subr.bf16.mxu1 %v272_v0  ;;  %225 = vmatprep.subr.bf16.mxu0 %v272_v0 }
  0x17   :  { %256 = vmatpush3.bf16.msra.mxu1 %v266_v6  ;;  %226 = vmatpush3.bf16.msra.mxu0 %v266_v6 }
  0x18   :  { %249 = vmatprep.subr.bf16.mxu1 %v272_v0  ;;  %227 = vmatprep.subr.bf16.mxu0 %v272_v0 }
  0x1b   :  { %257 = vmatpush3.bf16.msra.mxu1 %v267_v7  ;;  %228 = vmatpush3.bf16.msra.mxu0 %v267_v7 }
  0x1c   :  { %250 = vmatprep.subr.bf16.mxu1 %v272_v0  ;;  %229 = vmatprep.subr.bf16.mxu0 %v272_v0 }
  0x1f   :  { %258 = vmatpush3.bf16.msra.mxu1 %v268_v8  ;;  %230 = vmatpush3.bf16.msra.mxu0 %v268_v8 }
  0x22   :  { %236 = vmatmul.mubr.bf16.vlgmr.msra.gmra.mxu1 %v269_v9  ;;  %232 = vmatmul.mubr.bf16.vlgmr.msra.gmra.mxu0 %v270_v10 }
  0x23   :  { %239 = vmatprep.mubr.msk.bf16.mxu1 %vm273_vm0, %v272_v0 }
  0x2a   :  { %240 = vmatmul.mubr.bf16.gmra.mxu1 %v271_v11 }
  0xe2   :  { %v155_v13 = vpop.f32.mrf.mxu1  ;;  %v147_v15 = vpop.f32.mrf.mxu0 }
  0xe3   :  { %v156_v17 = vadd.f32 %v192_v12, %v155_v13  ;;  %v148_v18 = vadd.f32 %v192_v12, %v147_v15 }
  0xe4   :  { %v237_v19 = vpop.f32.mrf.mxu1  ;;  %v233_v20 = vpop.f32.mrf.mxu0 }
  0xe5   :  { %v178_v21 = vadd.f32 %v172_v14, %v156_v17  ;;  %v176_v22 = vadd.f32 %v170_v16, %v148_v18 }
  0xe6   :  { %v158_v23 = vpop.f32.mrf.mxu1  ;;  %v150_v25 = vpop.f32.mrf.mxu0 }
  0xe7   :  { %184 = vst [vmem:[%s378_s4 + $0x10] sm:$0xff] %v178_v21  ;;  %182 = vst [vmem:[%s378_s4] sm:$0xff] %v176_v22  ;;  %v159_v27 = vadd.f32 %v192_v12, %v158_v23  ;;  %v151_v28 = vadd.f32 %v192_v12, %v150_v25 }
  0xe8   :  { %v238_v29 = vpop.f32.mrf.mxu1  ;;  %v234_v30 = vpop.f32.mrf.mxu0 }
  0xe9   :  { %v179_v31 = vadd.f32 %v173_v24, %v159_v27  ;;  %v177_v32 = vadd.f32 %v171_v26, %v151_v28 }
  0xea   :  { %v163_v33 = vpop.f32.mrf.mxu1 }
  0xeb   :  { %185 = vst [vmem:[%s378_s4 + $0x18] sm:$0xff] %v179_v31  ;;  %183 = vst [vmem:[%s378_s4 + $0x8] sm:$0xff] %v177_v32  ;;  %v164_v35 = vadd.f32 %v192_v12, %v163_v33 }
  0xec   :  { %v241_v36 = vpop.f32.mrf.mxu1 }
  0xed   :  { %v180_v37 = vadd.f32 %v174_v34, %v164_v35 }
  0xee   :  { %v166_v38 = vpop.f32.mrf.mxu1 }
  0xef   :  { %186 = vst [vmem:[%s378_s4 + $0x20] sm:$0xff] %v180_v37  ;;  %v167_v40 = vadd.f32 %v192_v12, %v166_v38 }
  0xf0   :  { %v242_v41 = vpop.f32.mrf.mxu1 }
  0xf1   :  { %v181_v42 = vadd.f32 %v175_v39, %v167_v40 }
  0xf3   :  { %187 = vst [vmem:[%s378_s4 + $0x28] sm:$0xff] %v181_v42 }

// kernel: gpt_head_forward.22
= control target key start
LH: loop header
LB: loop body
LE: loop exit
PB: predicated region body
PF: predicated region fallthrough
CT: control target
= control target key end

     0   :  { %s1041_s12 = smov 0   ;;  %s1043_s13 = smov 0   ;;  %s1272_s0 = inlined_call_operand.vmem [shape: bf16[48,128], index: 0, kind: input, shape index: {}]   ;;  %s1273_s1 = inlined_call_operand.vmem [shape: bf16[128,512], index: 1, kind: input, shape index: {}]   ;;  %s1274_s2 = inlined_call_operand.vmem [shape: f32[1,512], index: 2, kind: input, shape index: {}]   ;;  %s1275_s3 = inlined_call_operand.vmem [shape: bf16[48,512], index: 3, kind: output, shape index: {}]  }
   0x1   :  { %s1045_s14 = smov 0   ;;  %s1047_s15 = smov 0  }
   0x2   :  { %s1049_s16 = smov 0  }
   0x3 LB: > { %s22_s17 = sadd.s32 1, %s1014_s15  ;;  %s823_s18 = sadd.s32 4294967295, %s1018_s16   ;;  %s1018_s16 = sphi %s1049_s16, %s13_s16   ;;  %s1014_s15 = sphi %s1047_s15, %s1280_s15   ;;  %s1010_s14 = sphi %s1045_s14, %s1279_s14   ;;  %s1006_s13 = sphi %s1043_s13, %s1278_s13   ;;  %s1002_s12 = sphi %s1041_s12, %s1277_s12  }
   0x4   : > { %p23_p0 = scmp.ge.s32.totalorder %s22_s17, 2  ;;  %p65_p1 = scmp.ne.s32.totalorder %s1006_s13, %s1002_s12 }
   0x5   : > { %p66_p2 = scmp.eq.s32.totalorder %s1018_s16, 0  ;;  %p123_p4 = scmp.eq.s32.totalorder %s823_s18, 1 }
   0x6   : > { %s1282_s17 = smov (%p23_p0, %s22_s17), 0  ;;  %s58_s20 = sadd.s32 1, %s1006_s13 }
   0x7   : > { %p67_p3 = por %p66_p2, %p65_p1  ;;  %s55_s19 = ssub.s32 %s1014_s15, %s1282_s17 }
   0x8   : > { %p56_p5 = scmp.eq.s32.totalorder %s55_s19, 0  ;;  %p1076_p6 = por %p123_p4, %p65_p1 }
   0x9   : > { %p827_p7 = scmp.ge.s32.totalorder %s1018_s16, 2 }
   0xa   : > { %s1081_s22 = scalar_select %p56_p5, %s1006_s13, %s58_s20  }
   0xb   : > { %154 = sbr.rel (%p827_p7) target bundleno = 28 (0x1c), region = 20 }
  0x10   : > { %157 = sbr.rel (!%p67_p3) target bundleno = 28 (0x1c), region = 24  ;;  %s159_s23 = sand.u32 (%p67_p3), 1, %s1006_s13  }
  0x11   : > { %s863_s24 = sshll.u32 (%p67_p3), %s1014_s15, 3  ;;  %s828_s25 = sshll.u32 (%p67_p3), %s159_s23, 7 }
  0x12   : > { %s1089_s28 = scalar_lea.vmem (%p67_p3), %s1273_s1, %s863_s24  ;;  %s161_s29 = scalar_lea.vmem (%p67_p3), [#allocation2], %s828_s25 }
  0x13   : > { %v223_v0 = vld [vmem:[%s1089_s28] sm:$0xff] (%p67_p3)  ;;  %v225_v1 = vld [vmem:[%s1089_s28 + $0x10] sm:$0xff] (%p67_p3) }
  0x14   : > { %v227_v2 = vld [vmem:[%s1089_s28 + $0x20] sm:$0xff] (%p67_p3)  ;;  %224 = vst [vmem:[%s161_s29] sm:$0xff] (%p67_p3), %v223_v0  ;;  %226 = vst [vmem:[%s161_s29 + $0x8] sm:$0xff] (%p67_p3), %v225_v1  ;;  %v229_v3 = vld [vmem:[%s1089_s28 + $0x30] sm:$0xff] (%p67_p3) }
  0x15   : > { %228 = vst [vmem:[%s161_s29 + $0x10] sm:$0xff] %v227_v2  ;;  %v231_v4 = vld [vmem:[%s1089_s28 + $0x40] sm:$0xff]  ;;  %v233_v5 = vld [vmem:[%s1089_s28 + $0x50] sm:$0xff]  ;;  %230 = vst [vmem:[%s161_s29 + $0x18] sm:$0xff] %v229_v3 }
  0x16   : > { %232 = vst [vmem:[%s161_s29 + $0x20] sm:$0xff] %v231_v4  ;;  %234 = vst [vmem:[%s161_s29 + $0x28] sm:$0xff] %v233_v5  ;;  %v235_v6 = vld [vmem:[%s1089_s28 + $0x60] sm:$0xff]  ;;  %v237_v7 = vld [vmem:[%s1089_s28 + $0x70] sm:$0xff] }
  0x17   : > { %v239_v8 = vld [vmem:[%s1089_s28 + $0x80] sm:$0xff]  ;;  %236 = vst [vmem:[%s161_s29 + $0x30] sm:$0xff] %v235_v6  ;;  %238 = vst [vmem:[%s161_s29 + $0x38] sm:$0xff] %v237_v7  ;;  %v241_v9 = vld [vmem:[%s1089_s28 + $0x90] sm:$0xff] }
  0x18   : > { %240 = vst [vmem:[%s161_s29 + $0x40] sm:$0xff] %v239_v8  ;;  %v243_v10 = vld [vmem:[%s1089_s28 + $0xa0] sm:$0xff]  ;;  %v245_v11 = vld [vmem:[%s1089_s28 + $0xb0] sm:$0xff]  ;;  %242 = vst [vmem:[%s161_s29 + $0x48] sm:$0xff] %v241_v9 }
  0x19   : > { %244 = vst [vmem:[%s161_s29 + $0x50] sm:$0xff] %v243_v10  ;;  %246 = vst [vmem:[%s161_s29 + $0x58] sm:$0xff] %v245_v11  ;;  %v247_v12 = vld [vmem:[%s1089_s28 + $0xc0] sm:$0xff]  ;;  %v249_v13 = vld [vmem:[%s1089_s28 + $0xd0] sm:$0xff] }
  0x1a   : > { %v251_v14 = vld [vmem:[%s1089_s28 + $0xe0] sm:$0xff]  ;;  %248 = vst [vmem:[%s161_s29 + $0x60] sm:$0xff] %v247_v12  ;;  %250 = vst [vmem:[%s161_s29 + $0x68] sm:$0xff] %v249_v13  ;;  %v253_v15 = vld [vmem:[%s1089_s28 + $0xf0] sm:$0xff] }
  0x1b   : > { %252 = vst [vmem:[%s161_s29 + $0x70] sm:$0xff] %v251_v14  ;;  %254 = vst [vmem:[%s161_s29 + $0x78] sm:$0xff] %v253_v15 }
  0x1c PF: > { %p831_p8 = scmp.ge.s32.totalorder %s1018_s16, 1  ;;  %p267_p9 = scmp.lt.s32.totalorder %s1018_s16, 3 }
  0x1e   : > { %p268_p10 = pnand %p831_p8, %p267_p9 }
  0x1f   : > { %s274_s30 = sand.u32 (!%p268_p10), 1, %s1002_s12   ;;  %s833_s18 = sshll.u32 (!%p268_p10), %s1010_s14, 1 }
  0x20   : > { %271 = sbr.rel (%p268_p10) target bundleno = 321 (0x141), region = 66  ;;  %s832_s4 = sshll.u32 (!%p268_p10), %s274_s30, 7 }
  0x21   : > { %s1112_s5 = scalar_lea.vmem (!%p268_p10), [#allocation2], %s832_s4  ;;  %p313_p11 = scmp.lt.s32.totalorder (!%p268_p10), %s833_s18, 3 }
  0x22   : > { %s887_s24 = smul.u32 (!%p268_p10), 48, %s274_s30 }
  0x24   : > { %s1229_s12 = scalar_lea.vmem (!%p268_p10), [#allocation3], %s887_s24 }
  0x25   : > { %v1020_v16 = vmov 0   ;;  %v929_v17 = vld [vmem:[%s1112_s5 + $0x74] ss:$8 sps:$4 sm:$0xff]   ;;  %v931_v18 = vld [vmem:[%s1112_s5 + $0x70] ss:$8 sps:$4 sm:$0xff]   ;;  %v953_v33 = vld [vmem:[%s1272_s0] sm:$0xff]   ;;  %v344_v36 = vlaneseq }
  0x26   : > { %484 = vmatprep.mubr.bf16.mxu0 %v1020_v16  ;;  %494 = vmatprep.mubr.bf16.mxu1 %v1020_v16  ;;  %v932_v19 = vld [vmem:[%s1112_s5 + $0x64] ss:$8 sps:$4 sm:$0xff]   ;;  %v934_v20 = vld [vmem:[%s1112_s5 + $0x60] ss:$8 sps:$4 sm:$0xff]   ;;  %v935_v21 = vld [vmem:[%s1112_s5 + $0x54] ss:$8 sps:$4 sm:$0xff]  }
  0x27   : > { %452 = vmatprep.subr.bf16.mxu0 %v929_v17  ;;  %871 = vmatprep.subr.bf16.mxu1 %v929_v17  ;;  %v937_v22 = vld [vmem:[%s1112_s5 + $0x50] ss:$8 sps:$4 sm:$0xff]   ;;  %v938_v23 = vld [vmem:[%s1112_s5 + $0x44] ss:$8 sps:$4 sm:$0xff]   ;;  %v940_v24 = vld [vmem:[%s1112_s5 + $0x40] ss:$8 sps:$4 sm:$0xff]  }
  0x28   : > { %453 = vmatpush1.bf16.msra.mxu0 %v931_v18  ;;  %879 = vmatpush1.bf16.msra.mxu1 %v931_v18  ;;  %v941_v25 = vld [vmem:[%s1112_s5 + $0x34] ss:$8 sps:$4 sm:$0xff]   ;;  %v943_v26 = vld [vmem:[%s1112_s5 + $0x30] ss:$8 sps:$4 sm:$0xff]   ;;  %v944_v27 = vld [vmem:[%s1112_s5 + $0x24] ss:$8 sps:$4 sm:$0xff]  }
  0x29   : > { %454 = vmatprep.subr.bf16.mxu0 %v932_v19  ;;  %872 = vmatprep.subr.bf16.mxu1 %v932_v19  ;;  %v946_v28 = vld [vmem:[%s1112_s5 + $0x20] ss:$8 sps:$4 sm:$0xff]   ;;  %v947_v29 = vld [vmem:[%s1112_s5 + $0x14] ss:$8 sps:$4 sm:$0xff]   ;;  %v949_v30 = vld [vmem:[%s1112_s5 + $0x10] ss:$8 sps:$4 sm:$0xff]  }
  0x2a   : > { %v950_v31 = vld [vmem:[%s1112_s5 + $0x4] ss:$8 sps:$4 sm:$0xff]   ;;  %v952_v32 = vld [vmem:[%s1112_s5] ss:$8 sps:$4 sm:$0xff]   ;;  %v955_v35 = vld [vmem:[%s1272_s0 + $0x10] sm:$0xff]   ;;  %s1284_s18 = smov (!%p313_p11, %s833_s18), 3 }
  0x2b   : > { %v954_v34 = vld [vmem:[%s1272_s0 + $0x8] sm:$0xff]   ;;  %v345_v37 = vshrl.u32 %v344_v36, 7  ;;  %s315_s23 = scalar_lea.vmem %s1274_s2, %s1284_s18  ;;  %s870_s25 = sshll.u32 (%p1076_p6), %s1010_s14, 3 }
  0x2c   : > { %455 = vmatpush1.bf16.msra.mxu0 %v934_v20  ;;  %880 = vmatpush1.bf16.msra.mxu1 %v934_v20  ;;  %v342_v39 = vld [vmem:[%s315_s23] sm:$0x3]  ;;  %s677_s28 = scalar_lea.vmem (%p1076_p6), %s1275_s3, %s870_s25 }
  0x2d   : > { %456 = vmatprep.subr.bf16.mxu0 %v935_v21  ;;  %873 = vmatprep.subr.bf16.mxu1 %v935_v21  ;;  %v346_v38 = vsub.s32 0, %v345_v37  ;;  %v350_v40 = vsub.s32 1, %v345_v37 }
  0x2f   : > { %v347_v41 = vrot.slane %v342_v39, %v346_v38  ;;  %v1143_v44 = vrot.slane %v342_v39, %v350_v40 }
  0x30   : > { %457 = vmatpush1.bf16.msra.mxu0 %v937_v22  ;;  %881 = vmatpush1.bf16.msra.mxu1 %v937_v22 }
  0x31   : > { %458 = vmatprep.subr.bf16.mxu0 %v938_v23  ;;  %874 = vmatprep.subr.bf16.mxu1 %v938_v23 }
  0x34   : > { %459 = vmatpush1.bf16.msra.mxu0 %v940_v24  ;;  %882 = vmatpush1.bf16.msra.mxu1 %v940_v24 }
  0x35   : > { %460 = vmatprep.subr.bf16.mxu0 %v941_v25  ;;  %875 = vmatprep.subr.bf16.mxu1 %v941_v25 }
  0x38   : > { %461 = vmatpush1.bf16.msra.mxu0 %v943_v26  ;;  %883 = vmatpush1.bf16.msra.mxu1 %v943_v26 }
  0x39   : > { %462 = vmatprep.subr.bf16.mxu0 %v944_v27  ;;  %876 = vmatprep.subr.bf16.mxu1 %v944_v27 }
  0x3c   : > { %463 = vmatpush1.bf16.msra.mxu0 %v946_v28  ;;  %884 = vmatpush1.bf16.msra.mxu1 %v946_v28 }
  0x3d   : > { %464 = vmatprep.subr.bf16.mxu0 %v947_v29  ;;  %877 = vmatprep.subr.bf16.mxu1 %v947_v29 }
  0x40   : > { %465 = vmatpush1.bf16.msra.mxu0 %v949_v30  ;;  %885 = vmatpush1.bf16.msra.mxu1 %v949_v30 }
  0x41   : > { %466 = vmatprep.subr.bf16.mxu0 %v950_v31  ;;  %878 = vmatprep.subr.bf16.mxu1 %v950_v31 }
  0x44   : > { %467 = vmatpush1.bf16.msra.mxu0 %v952_v32  ;;  %886 = vmatpush1.bf16.msra.mxu1 %v952_v32 }
  0x47   : > { %485 = vmatmul.mubr.bf16.vlgmr.msra.gmra.mxu0 %v953_v33  ;;  %495 = vmatmul.mubr.bf16.vlgmr.msra.gmra.mxu1 %v954_v34 }
  0x48   : > { %504 = vmatprep.mubr.bf16.mxu1 %v1020_v16 }
  0x4f   : > { %505 = vmatmul.mubr.bf16.gmra.mxu1 %v955_v35 }
 0x107   : > { %v486_v42 = vpop.f32.mrf.mxu0  ;;  %v496_v43 = vpop.f32.mrf.mxu1 }
 0x108   : > { %v1145_v45 = vadd.f32 %v486_v42, %v347_v41  ;;  %v1147_v46 = vadd.f32 %v496_v43, %v347_v41 }
 0x109   : > { %v488_v47 = vpop.f32.mrf.mxu0  ;;  %v498_v48 = vpop.f32.mrf.mxu1 }
 0x10a   : > { %v527_v49 = vmul.f32 0.044715, %v1145_v45  ;;  %v531_v50 = vmul.f32 0.044715, %v1147_v46  ;;  %v1152_v51 = vadd.f32 %v488_v47, %v1143_v44  ;;  %v1155_v52 = vadd.f32 %v498_v48, %v1143_v44 }
 0x10b   : > { %v490_v53 = vpop.f32.mrf.mxu0  ;;  %v500_v54 = vpop.f32.mrf.mxu1 }
 0x10c   : > { %v539_v55 = vmul.f32 %v527_v49, %v1145_v45  ;;  %v543_v56 = vmul.f32 %v531_v50, %v1147_v46  ;;  %v1159_v57 = vadd.f32 %v490_v53, %v347_v41  ;;  %v1161_v58 = vadd.f32 %v500_v54, %v347_v41 }
 0x10d   : > { %v528_v59 = vmul.f32 0.044715, %v1152_v51  ;;  %v532_v60 = vmul.f32 0.044715, %v1155_v52  ;;  %v492_v61 = vpop.f32.mrf.mxu0  ;;  %v502_v62 = vpop.f32.mrf.mxu1 }
 0x10e   : > { %v551_v63 = vmul.f32 %v539_v55, %v1145_v45  ;;  %v555_v0 = vmul.f32 %v543_v56, %v1147_v46  ;;  %v529_v1 = vmul.f32 0.044715, %v1159_v57  ;;  %v533_v4 = vmul.f32 0.044715, %v1161_v58 }
 0x10f   : > { %v540_v2 = vmul.f32 %v528_v59, %v1152_v51  ;;  %v544_v3 = vmul.f32 %v532_v60, %v1155_v52  ;;  %v506_v5 = vpop.f32.mrf.mxu1  ;;  %v1175_v9 = vadd.f32 %v492_v61, %v1143_v44  ;;  %v1181_v13 = vadd.f32 %v502_v62, %v1143_v44 }
 0x110   : > { %v563_v6 = vadd.f32 %v551_v63, %v1145_v45  ;;  %v567_v7 = vadd.f32 %v555_v0, %v1147_v46  ;;  %v541_v8 = vmul.f32 %v529_v1, %v1159_v57  ;;  %v545_v12 = vmul.f32 %v533_v4, %v1161_v58 }
 0x111   : > { %v552_v10 = vmul.f32 %v540_v2, %v1152_v51  ;;  %v556_v11 = vmul.f32 %v544_v3, %v1155_v52  ;;  %v508_v14 = vpop.f32.mrf.mxu1  ;;  %v530_v21 = vmul.f32 0.044715, %v1175_v9  ;;  %v534_v23 = vmul.f32 0.044715, %v1181_v13 }
 0x112   : > { %v575_v15 = vmul.f32 0.7978846, %v563_v6  ;;  %v579_v16 = vmul.f32 0.7978846, %v567_v7  ;;  %v553_v17 = vmul.f32 %v541_v8, %v1159_v57  ;;  %v557_v20 = vmul.f32 %v545_v12, %v1161_v58 }
 0x113   : > { %v564_v18 = vadd.f32 %v552_v10, %v1152_v51  ;;  %v568_v19 = vadd.f32 %v556_v11, %v1155_v52  ;;  %v510_v24 = vpop.f32.mrf.mxu1  ;;  %v542_v29 = vmul.f32 %v530_v21, %v1175_v9  ;;  %v546_v30 = vmul.f32 %v534_v23, %v1181_v13 }
 0x114   : > { %956 = vtanh.f32 %v575_v15  ;;  %v565_v22 = vadd.f32 %v553_v17, %v1159_v57  ;;  %v569_v27 = vadd.f32 %v557_v20, %v1161_v58  ;;  %v1193_v31 = vadd.f32 %v506_v5, %v347_v41 }
 0x115   : > { %958 = vtanh.f32 %v579_v16  ;;  %v576_v25 = vmul.f32 0.7978846, %v564_v18  ;;  %v580_v26 = vmul.f32 0.7978846, %v568_v19  ;;  %v1196_v33 = vadd.f32 %v508_v14, %v1143_v44  ;;  %v512_v37 = vpop.f32.mrf.mxu1 }
 0x116   : > { %v577_v28 = vmul.f32 0.7978846, %v565_v22  ;;  %v581_v32 = vmul.f32 0.7978846, %v569_v27  ;;  %v1198_v34 = vadd.f32 %v510_v24, %v347_v41  ;;  %v554_v35 = vmul.f32 %v542_v29, %v1175_v9 }
 0x117   : > { %960 = vtanh.f32 %v576_v25  ;;  %v558_v36 = vmul.f32 %v546_v30, %v1181_v13  ;;  %v535_v38 = vmul.f32 0.044715, %v1193_v31  ;;  %v536_v39 = vmul.f32 0.044715, %v1196_v33 }
 0x118   : > { %962 = vtanh.f32 %v580_v26  ;;  %v566_v40 = vadd.f32 %v554_v35, %v1175_v9  ;;  %v537_v47 = vmul.f32 0.044715, %v1198_v34  ;;  %v1210_v48 = vadd.f32 %v512_v37, %v1143_v44 }
 0x119   : > { %964 = vtanh.f32 %v577_v28  ;;  %v570_v42 = vadd.f32 %v558_v36, %v1181_v13  ;;  %v547_v43 = vmul.f32 %v535_v38, %v1193_v31  ;;  %v548_v41 = vmul.f32 %v536_v39, %v1196_v33 }
 0x11a   : > { %966 = vtanh.f32 %v581_v32  ;;  %v578_v49 = vmul.f32 0.7978846, %v566_v40  ;;  %v549_v55 = vmul.f32 %v537_v47, %v1198_v34  ;;  %v538_v56 = vmul.f32 0.044715, %v1210_v48 }
 0x11b   : > { %v582_v50 = vmul.f32 0.7978846, %v570_v42  ;;  %v559_v53 = vmul.f32 %v547_v43, %v1193_v31  ;;  %v560_v54 = vmul.f32 %v548_v41, %v1196_v33  ;;  %v515_v11 = vmul.f32 0.5, %v1145_v45 }
 0x11c   : > { %968 = vtanh.f32 %v578_v49  ;;  %v561_v44 = vmul.f32 %v549_v55, %v1198_v34  ;;  %v550_v61 = vmul.f32 %v538_v56, %v1210_v48  ;;  %v516_v12 = vmul.f32 0.5, %v1152_v51 }
 0x11d   : > { %970 = vtanh.f32 %v582_v50  ;;  %v571_v59 = vadd.f32 %v559_v53, %v1193_v31  ;;  %v572_v60 = vadd.f32 %v560_v54, %v1196_v33  ;;  %v519_v16 = vmul.f32 0.5, %v1147_v46 }
 0x11e   : > { %v573_v1 = vadd.f32 %v561_v44, %v1198_v34  ;;  %v562_v3 = vmul.f32 %v550_v61, %v1210_v48  ;;  %v520_v17 = vmul.f32 0.5, %v1155_v52  ;;  %v517_v52 = vmul.f32 0.5, %v1159_v57 }
 0x11f   : > { %v583_v63 = vmul.f32 0.7978846, %v571_v59  ;;  %v584_v0 = vmul.f32 0.7978846, %v572_v60  ;;  %v518_v28 = vmul.f32 0.5, %v1175_v9  ;;  %v521_v30 = vmul.f32 0.5, %v1161_v58 }
 0x120   : > { %v585_v5 = vmul.f32 0.7978846, %v573_v1  ;;  %v574_v8 = vadd.f32 %v562_v3, %v1210_v48  ;;  %v522_v32 = vmul.f32 0.5, %v1181_v13  ;;  %v523_v9 = vmul.f32 0.5, %v1193_v31 }
 0x121   : > { %v957_v62 = vpop.eup %956  ;;  %972 = vtanh.f32 %v583_v63  ;;  %v524_v58 = vmul.f32 0.5, %v1196_v33  ;;  %v525_v56 = vmul.f32 0.5, %v1198_v34  ;;  %v526_v59 = vmul.f32 0.5, %v1210_v48 }
 0x122   : > { %v959_v2 = vpop.eup %958  ;;  %v599_v4 = vadd.f32 1.0, %v957_v62  ;;  %974 = vtanh.f32 %v584_v0  ;;  %v586_v19 = vmul.f32 0.7978846, %v574_v8 }
 0x123   : > { %v603_v7 = vadd.f32 1.0, %v959_v2  ;;  %976 = vtanh.f32 %v585_v5 }
 0x124   : > { %v961_v6 = vpop.eup %960  ;;  %v611_v21 = vmul.f32 %v599_v4, %v515_v11  ;;  %978 = vtanh.f32 %v586_v19 }
 0x125   : > { %v963_v10 = vpop.eup %962  ;;  %v600_v14 = vadd.f32 1.0, %v961_v6  ;;  %v615_v23 = vmul.f32 %v603_v7, %v519_v16 }
 0x126   : > { %v965_v15 = vpop.eup %964  ;;  %v604_v18 = vadd.f32 1.0, %v963_v10 }
 0x127   : > { %v967_v20 = vpop.eup %966  ;;  %v612_v22 = vmul.f32 %v600_v14, %v516_v12  ;;  %v601_v45 = vadd.f32 1.0, %v965_v15 }
 0x128   : > { %v616_v24 = vmul.f32 %v604_v18, %v520_v17  ;;  %v605_v46 = vadd.f32 1.0, %v967_v20 }
 0x129   : > { %v864_v25 = vpack.c.bf16 %v612_v22, %v611_v21  ;;  %v969_v27 = vpop.eup %968  ;;  %v613_v36 = vmul.f32 %v601_v45, %v517_v52 }
 0x12a   : > { %v866_v26 = vpack.c.bf16 %v616_v24, %v615_v23  ;;  %v971_v51 = vpop.eup %970  ;;  %v602_v29 = vadd.f32 1.0, %v969_v27  ;;  %v617_v38 = vmul.f32 %v605_v46, %v521_v30 }
 0x12b   : > { %659 = vst [vmem:[%s1229_s12] sm:$0xff] %v864_v25  ;;  %v606_v35 = vadd.f32 1.0, %v971_v51 }
 0x12c   : > { %661 = vst [vmem:[%s1229_s12 + $0x10] sm:$0xff] %v866_v26  ;;  %v614_v37 = vmul.f32 %v602_v29, %v518_v28 }
 0x12d   : > { %v618_v39 = vmul.f32 %v606_v35, %v522_v32 }
 0x12e   : > { %v973_v40 = vpop.eup %972  ;;  %v865_v42 = vpack.c.bf16 %v614_v37, %v613_v36 }
 0x12f   : > { %v975_v43 = vpop.eup %974  ;;  %v867_v41 = vpack.c.bf16 %v618_v39, %v617_v38  ;;  %v607_v57 = vadd.f32 1.0, %v973_v40 }
 0x130   : > { %v977_v47 = vpop.eup %976  ;;  %660 = vst [vmem:[%s1229_s12 + $0x8] sm:$0xff] %v865_v42  ;;  %v608_v13 = vadd.f32 1.0, %v975_v43 }
 0x131   : > { %662 = vst [vmem:[%s1229_s12 + $0x18] sm:$0xff] %v867_v41  ;;  %v619_v49 = vmul.f32 %v607_v57, %v523_v9  ;;  %v609_v53 = vadd.f32 1.0, %v977_v47  ;;  %v979_v54 = vpop.eup %978 }
 0x132   : > { %v620_v50 = vmul.f32 %v608_v13, %v524_v58  ;;  %v610_v60 = vadd.f32 1.0, %v979_v54  ;;  %v716_v31 = vld [vmem:[%s1229_s12] sm:$0xff] (%p1076_p6) }
 0x133   : > { %v621_v44 = vmul.f32 %v609_v53, %v525_v56  ;;  %v720_v34 = vld [vmem:[%s1229_s12 + $0x10] sm:$0xff] (%p1076_p6)  ;;  %717 = vst [vmem:[%s677_s28] sm:$0xff] (%p1076_p6), %v716_v31 }
 0x134   : > { %v868_v55 = vpack.c.bf16 %v620_v50, %v619_v49  ;;  %v622_v61 = vmul.f32 %v610_v60, %v526_v59  ;;  %671 = sbr.rel (!%p1076_p6) target bundleno = 321 (0x141), region = 74  ;;  %721 = vst [vmem:[%s677_s28 + $0x20] sm:$0xff] (%p1076_p6), %v720_v34 }
 0x136   : > { %663 = vst [vmem:[%s1229_s12 + $0x20] sm:$0xff] %v868_v55  ;;  %v869_v62 = vpack.c.bf16 %v622_v61, %v621_v44 }
 0x137   : > { %v718_v33 = vld [vmem:[%s1229_s12 + $0x8] sm:$0xff] (%p1076_p6) }
 0x138   : > { %664 = vst [vmem:[%s1229_s12 + $0x28] sm:$0xff] %v869_v62  ;;  %v722_v48 = vld [vmem:[%s1229_s12 + $0x18] sm:$0xff] (%p1076_p6)  ;;  %719 = vst [vmem:[%s677_s28 + $0x10] sm:$0xff] (%p1076_p6), %v718_v33 }
 0x139   : > { %723 = vst [vmem:[%s677_s28 + $0x30] sm:$0xff] %v722_v48 }
 0x13d   : > { %v724_v63 = vld [vmem:[%s1229_s12 + $0x20] sm:$0xff] }
 0x13e   : > { %725 = vst [vmem:[%s677_s28 + $0x40] sm:$0xff] %v724_v63 }
 0x13f   : > { %v726_v0 = vld [vmem:[%s1229_s12 + $0x28] sm:$0xff] }
 0x140   : > { %727 = vst [vmem:[%s677_s28 + $0x50] sm:$0xff] %v726_v0 }
 0x141 PF: > { %s13_s16 = sadd.s32 1, %s1018_s16   ;;  %s1277_s12 = smov %s1006_s13 }
 0x142   : > { %p10_p12 = scmp.ge.s32.totalorder %s13_s16, 4   ;;  %s1278_s13 = smov %s1081_s22 }
 0x143   : > { %s1279_s14 = smov %s1014_s15  ;;  %s1280_s15 = smov %s1282_s17 }
 0x144   :  { %12 = sbr.rel (!%p10_p12) target bundleno = 3 (0x3), region = 149 }

// kernel: gpt_head_forward.25
= control target key start
LH: loop header
LB: loop body
LE: loop exit
PB: predicated region body
PF: predicated region fallthrough
CT: control target
= control target key end

     0   :  { %s890_s12 = smov 0   ;;  %s892_s13 = smov 0   ;;  %s1011_s0 = inlined_call_operand.vmem [shape: bf16[48,128], index: 0, kind: input, shape index: {}]   ;;  %s1012_s1 = inlined_call_operand.vmem [shape: bf16[128,384], index: 1, kind: input, shape index: {}]   ;;  %s1013_s2 = inlined_call_operand.vmem [shape: f32[1,384], index: 2, kind: input, shape index: {}]   ;;  %s1014_s3 = inlined_call_operand.vmem [shape: bf16[48,384], index: 3, kind: output, shape index: {}]  }
   0x1   :  { %s894_s14 = smov 0   ;;  %s896_s15 = smov 0  }
   0x2   :  { %s898_s16 = smov 0  }
   0x3 LB: > { %s22_s17 = sadd.s32 1, %s862_s15  ;;  %s666_s18 = sadd.s32 4294967295, %s866_s16   ;;  %s866_s16 = sphi %s898_s16, %s13_s16   ;;  %s862_s15 = sphi %s896_s15, %s1019_s15   ;;  %s858_s14 = sphi %s894_s14, %s1018_s14   ;;  %s854_s13 = sphi %s892_s13, %s1017_s13   ;;  %s850_s12 = sphi %s890_s12, %s1016_s12  }
   0x4   : > { %p23_p0 = scmp.ge.s32.totalorder %s22_s17, 3  ;;  %p65_p1 = scmp.ne.s32.totalorder %s854_s13, %s850_s12 }
   0x5   : > { %p66_p2 = scmp.eq.s32.totalorder %s866_s16, 0  ;;  %p123_p4 = scmp.eq.s32.totalorder %s666_s18, 2 }
   0x6   : > { %s1021_s17 = smov (%p23_p0, %s22_s17), 0  ;;  %s58_s20 = sadd.s32 1, %s854_s13 }
   0x7   : > { %p67_p3 = por %p66_p2, %p65_p1  ;;  %s55_s19 = ssub.s32 %s862_s15, %s1021_s17 }
   0x8   : > { %p56_p5 = scmp.eq.s32.totalorder %s55_s19, 0  ;;  %p925_p6 = por %p123_p4, %p65_p1 }
   0x9   : > { %p670_p7 = scmp.ge.s32.totalorder %s866_s16, 3 }
   0xa   : > { %s930_s22 = scalar_select %p56_p5, %s854_s13, %s58_s20  }
   0xb   : > { %154 = sbr.rel (%p670_p7) target bundleno = 30 (0x1e), region = 20 }
  0x10   : > { %157 = sbr.rel (!%p67_p3) target bundleno = 30 (0x1e), region = 24  ;;  %s159_s23 = sand.u32 (%p67_p3), 1, %s854_s13  }
  0x11   : > { %s672_s24 = sshll.u32 (%p67_p3), %s862_s15, 2  ;;  %s671_s25 = sshll.u32 (%p67_p3), %s159_s23, 6 }
  0x12   : > { %s938_s28 = scalar_lea.vmem (%p67_p3), %s1012_s1, %s672_s24  ;;  %s161_s29 = scalar_lea.vmem (%p67_p3), [#allocation2], %s671_s25 }
  0x13   : > { %v180_v0 = vld [vmem:[%s938_s28] sm:$0xf] (%p67_p3)  ;;  %v182_v1 = vld [vmem:[%s938_s28 + $0xc] sm:$0xf] (%p67_p3)  ;;  %v184_v2 = vld [vmem:[%s938_s28 + $0x18] sm:$0xf] (%p67_p3) }
  0x14   : > { %181 = vst [vmem:[%s161_s29] sm:$0xf] (%p67_p3), %v180_v0  ;;  %183 = vst [vmem:[%s161_s29 + $0x4] sm:$0xf] (%p67_p3), %v182_v1  ;;  %v186_v3 = vld [vmem:[%s938_s28 + $0x24] sm:$0xf] (%p67_p3) }
  0x15   : > { %v188_v4 = vld [vmem:[%s938_s28 + $0x30] sm:$0xf]  ;;  %185 = vst [vmem:[%s161_s29 + $0x8] sm:$0xf] %v184_v2  ;;  %187 = vst [vmem:[%s161_s29 + $0xc] sm:$0xf] %v186_v3 }
  0x16   : > { %189 = vst [vmem:[%s161_s29 + $0x10] sm:$0xf] %v188_v4  ;;  %v190_v5 = vld [vmem:[%s938_s28 + $0x3c] sm:$0xf]  ;;  %v192_v6 = vld [vmem:[%s938_s28 + $0x48] sm:$0xf] }
  0x17   : > { %v194_v7 = vld [vmem:[%s938_s28 + $0x54] sm:$0xf]  ;;  %191 = vst [vmem:[%s161_s29 + $0x14] sm:$0xf] %v190_v5  ;;  %193 = vst [vmem:[%s161_s29 + $0x18] sm:$0xf] %v192_v6 }
  0x18   : > { %195 = vst [vmem:[%s161_s29 + $0x1c] sm:$0xf] %v194_v7  ;;  %v196_v8 = vld [vmem:[%s938_s28 + $0x60] sm:$0xf]  ;;  %v198_v9 = vld [vmem:[%s938_s28 + $0x6c] sm:$0xf] }
  0x19   : > { %v200_v10 = vld [vmem:[%s938_s28 + $0x78] sm:$0xf]  ;;  %197 = vst [vmem:[%s161_s29 + $0x20] sm:$0xf] %v196_v8  ;;  %199 = vst [vmem:[%s161_s29 + $0x24] sm:$0xf] %v198_v9 }
  0x1a   : > { %201 = vst [vmem:[%s161_s29 + $0x28] sm:$0xf] %v200_v10  ;;  %v202_v11 = vld [vmem:[%s938_s28 + $0x84] sm:$0xf]  ;;  %v204_v12 = vld [vmem:[%s938_s28 + $0x90] sm:$0xf] }
  0x1b   : > { %v206_v13 = vld [vmem:[%s938_s28 + $0x9c] sm:$0xf]  ;;  %203 = vst [vmem:[%s161_s29 + $0x2c] sm:$0xf] %v202_v11  ;;  %205 = vst [vmem:[%s161_s29 + $0x30] sm:$0xf] %v204_v12 }
  0x1c   : > { %207 = vst [vmem:[%s161_s29 + $0x34] sm:$0xf] %v206_v13  ;;  %v208_v14 = vld [vmem:[%s938_s28 + $0xa8] sm:$0xf]  ;;  %v210_v15 = vld [vmem:[%s938_s28 + $0xb4] sm:$0xf] }
  0x1d   : > { %209 = vst [vmem:[%s161_s29 + $0x38] sm:$0xf] %v208_v14  ;;  %211 = vst [vmem:[%s161_s29 + $0x3c] sm:$0xf] %v210_v15 }
  0x1e PF: > { %p673_p8 = scmp.ge.s32.totalorder %s866_s16, 1  ;;  %p272_p9 = scmp.lt.s32.totalorder %s866_s16, 4 }
  0x20   : > { %p273_p10 = pnand %p673_p8, %p272_p9 }
  0x21   : > { %s279_s30 = sand.u32 (!%p273_p10), 1, %s850_s12   ;;  %p315_p11 = scmp.lt.s32.totalorder (!%p273_p10), %s858_s14, 2 }
  0x22   : > { %276 = sbr.rel (%p273_p10) target bundleno = 291 (0x123), region = 69  ;;  %s674_s4 = sshll.u32 (!%p273_p10), %s279_s30, 6 }
  0x23   : > { %s963_s5 = scalar_lea.vmem (!%p273_p10), [#allocation2], %s674_s4  ;;  %s774_s24 = smul.u32 (!%p273_p10), 24, %s279_s30 }
  0x25   : > { %s308_s25 = scalar_lea.vmem (!%p273_p10), [#allocation3], %s774_s24 }
  0x27   : > { %v868_v16 = vmov 0.0   ;;  %vm869_vm0 = vmmov 0   ;;  %v817_v17 = vld [vmem:[%s963_s5 + $0x38] sm:$0xff]   ;;  %v818_v18 = vld [vmem:[%s963_s5 + $0x30] sm:$0xff]   ;;  %v819_v19 = vld [vmem:[%s963_s5 + $0x28] sm:$0xff]   ;;  %s316_s18 = scalar_select %p315_p11, %s858_s14, 2 }
  0x28   : > { %758 = vmatprep.subr.bf16.mxu1 %v868_v16  ;;  %730 = vmatprep.subr.bf16.mxu0 %v868_v16  ;;  %v820_v20 = vld [vmem:[%s963_s5 + $0x20] sm:$0xff]   ;;  %v821_v21 = vld [vmem:[%s963_s5 + $0x18] sm:$0xff]   ;;  %v822_v22 = vld [vmem:[%s963_s5 + $0x10] sm:$0xff]   ;;  %s693_s12 = sshll.u32 (%p925_p6), %s858_s14, 2 }
  0x29   : > { %750 = vmatprep.mubr.msk.bf16.mxu1 %vm869_vm0, %v868_v16  ;;  %746 = vmatprep.mubr.msk.bf16.mxu0 %vm869_vm0, %v868_v16  ;;  %v823_v23 = vld [vmem:[%s963_s5 + $0x8] sm:$0xff]   ;;  %v824_v24 = vld [vmem:[%s963_s5] sm:$0xff]   ;;  %v827_v27 = vld [vmem:[%s1011_s0 + $0x10] sm:$0xff]   ;;  %s317_s23 = scalar_lea.vmem %s1013_s2, %s316_s18  ;;  %s513_s28 = scalar_lea.vmem (%p925_p6), %s1014_s3, %s693_s12 }
  0x2a   : > { %766 = vmatpush3.bf16.msra.mxu1 %v817_v17  ;;  %731 = vmatpush3.bf16.msra.mxu0 %v817_v17  ;;  %v825_v25 = vld [vmem:[%s1011_s0 + $0x8] sm:$0xff]   ;;  %v826_v26 = vld [vmem:[%s1011_s0] sm:$0xff]  }
  0x2b   : > { %759 = vmatprep.subr.bf16.mxu1 %v868_v16  ;;  %732 = vmatprep.subr.bf16.mxu0 %v868_v16  ;;  %v675_v30 = vld [vmem:[%s317_s23] ss:$0 sm:$0xff] }
  0x2e   : > { %767 = vmatpush3.bf16.msra.mxu1 %v818_v18  ;;  %733 = vmatpush3.bf16.msra.mxu0 %v818_v18 }
  0x2f   : > { %760 = vmatprep.subr.bf16.mxu1 %v868_v16  ;;  %734 = vmatprep.subr.bf16.mxu0 %v868_v16 }
  0x32   : > { %768 = vmatpush3.bf16.msra.mxu1 %v819_v19  ;;  %735 = vmatpush3.bf16.msra.mxu0 %v819_v19 }
  0x33   : > { %761 = vmatprep.subr.bf16.mxu1 %v868_v16  ;;  %736 = vmatprep.subr.bf16.mxu0 %v868_v16 }
  0x36   : > { %769 = vmatpush3.bf16.msra.mxu1 %v820_v20  ;;  %737 = vmatpush3.bf16.msra.mxu0 %v820_v20 }
  0x37   : > { %762 = vmatprep.subr.bf16.mxu1 %v868_v16  ;;  %738 = vmatprep.subr.bf16.mxu0 %v868_v16 }
  0x3a   : > { %770 = vmatpush3.bf16.msra.mxu1 %v821_v21  ;;  %739 = vmatpush3.bf16.msra.mxu0 %v821_v21 }
  0x3b   : > { %763 = vmatprep.subr.bf16.mxu1 %v868_v16  ;;  %740 = vmatprep.subr.bf16.mxu0 %v868_v16 }
  0x3e   : > { %771 = vmatpush3.bf16.msra.mxu1 %v822_v22  ;;  %741 = vmatpush3.bf16.msra.mxu0 %v822_v22 }
  0x3f   : > { %764 = vmatprep.subr.bf16.mxu1 %v868_v16  ;;  %742 = vmatprep.subr.bf16.mxu0 %v868_v16 }
  0x42   : > { %772 = vmatpush3.bf16.msra.mxu1 %v823_v23  ;;  %743 = vmatpush3.bf16.msra.mxu0 %v823_v23 }
  0x43   : > { %765 = vmatprep.subr.bf16.mxu1 %v868_v16  ;;  %744 = vmatprep.subr.bf16.mxu0 %v868_v16 }
  0x46   : > { %773 = vmatpush3.bf16.msra.mxu1 %v824_v24  ;;  %745 = vmatpush3.bf16.msra.mxu0 %v824_v24 }
  0x49   : > { %751 = vmatmul.mubr.bf16.vlgmr.msra.gmra.mxu1 %v825_v25  ;;  %747 = vmatmul.mubr.bf16.vlgmr.msra.gmra.mxu0 %v826_v26 }
  0x4a   : > { %754 = vmatprep.mubr.msk.bf16.mxu1 %vm869_vm0, %v868_v16 }
  0x51   : > { %755 = vmatmul.mubr.bf16.gmra.mxu1 %v827_v27 }
 0x109   : > { %v457_v28 = vpop.f32.mrf.mxu1  ;;  %v449_v29 = vpop.f32.mrf.mxu0 }
 0x10a   : > { %v450_v33 = vadd.f32 %v675_v30, %v449_v29  ;;  %v458_v36 = vadd.f32 %v675_v30, %v457_v28 }
 0x10b   : > { %v752_v31 = vpop.f32.mrf.mxu1  ;;  %v748_v32 = vpop.f32.mrf.mxu0 }
 0x10d   : > { %v460_v34 = vpop.f32.mrf.mxu1  ;;  %v452_v35 = vpop.f32.mrf.mxu0 }
 0x10e   : > { %v461_v37 = vadd.f32 %v675_v30, %v460_v34  ;;  %v453_v38 = vadd.f32 %v675_v30, %v452_v35 }
 0x10f   : > { %v753_v39 = vpop.f32.mrf.mxu1  ;;  %v749_v40 = vpop.f32.mrf.mxu0 }
 0x110   : > { %v710_v41 = vpack.c.bf16 %v461_v37, %v458_v36  ;;  %v705_v42 = vpack.c.bf16 %v453_v38, %v450_v33 }
 0x111   : > { %v465_v43 = vpop.f32.mrf.mxu1 }
 0x112   : > { %717 = vst [vmem:[%s308_s25 + $0x8] sm:$0xff] %v710_v41   ;;  %706 = vst [vmem:[%s308_s25] sm:$0xff] %v705_v42   ;;  %v466_v46 = vadd.f32 %v675_v30, %v465_v43 }
 0x113   : > { %v756_v44 = vpop.f32.mrf.mxu1 }
 0x115   : > { %v468_v45 = vpop.f32.mrf.mxu1 }
 0x116   : > { %v469_v47 = vadd.f32 %v675_v30, %v468_v45  ;;  %508 = sbr.rel (!%p925_p6) target bundleno = 291 (0x123), region = 77 }
 0x117   : > { %v757_v48 = vpop.f32.mrf.mxu1 }
 0x118   : > { %v715_v49 = vpack.c.bf16 %v469_v47, %v466_v46 }
 0x119   : > { %v530_v50 = vld [vmem:[%s308_s25] sm:$0xf] (%p925_p6)  ;;  %v532_v51 = vld [vmem:[%s308_s25 + $0x4] sm:$0xf] (%p925_p6)  ;;  %v534_v52 = vld [vmem:[%s308_s25 + $0x8] sm:$0xf] (%p925_p6) }
 0x11a   : > { %718 = vst [vmem:[%s308_s25 + $0x10] sm:$0xff] %v715_v49   ;;  %v536_v53 = vld [vmem:[%s308_s25 + $0xc] sm:$0xf] (%p925_p6)  ;;  %531 = vst [vmem:[%s513_s28] sm:$0xf] (%p925_p6), %v530_v50 }
 0x11b   : > { %533 = vst [vmem:[%s513_s28 + $0xc] sm:$0xf] %v532_v51  ;;  %535 = vst [vmem:[%s513_s28 + $0x18] sm:$0xf] %v534_v52 }
 0x11c   : > { %537 = vst [vmem:[%s513_s28 + $0x24] sm:$0xf] %v536_v53 }
 0x121   : > { %v538_v54 = vld [vmem:[%s308_s25 + $0x10] sm:$0xf]  ;;  %v540_v55 = vld [vmem:[%s308_s25 + $0x14] sm:$0xf] }
 0x122   : > { %539 = vst [vmem:[%s513_s28 + $0x30] sm:$0xf] %v538_v54  ;;  %541 = vst [vmem:[%s513_s28 + $0x3c] sm:$0xf] %v540_v55 }
 0x123 PF: > { %s13_s16 = sadd.s32 1, %s866_s16   ;;  %s1016_s12 = smov %s854_s13 }
 0x124   : > { %p10_p12 = scmp.ge.s32.totalorder %s13_s16, 5   ;;  %s1017_s13 = smov %s930_s22 }
 0x125   : > { %s1018_s14 = smov %s862_s15  ;;  %s1019_s15 = smov %s1021_s17 }
 0x126   :  { %12 = sbr.rel (!%p10_p12) target bundleno = 3 (0x3), region = 155 }

// kernel: gpt_head_forward.33
= control target key start
LH: loop header
LB: loop body
LE: loop exit
PB: predicated region body
PF: predicated region fallthrough
CT: control target
= control target key end

     0   :  { %v180_v0 = vmov 0.0   ;;  %vm181_vm0 = vmmov 0   ;;  %s230_s1 = inlined_call_operand.vmem [shape: bf16[128,128], index: 1, kind: input, shape index: {}]   ;;  %s231_s0 = inlined_call_operand.vmem [shape: bf16[16,128], index: 0, kind: input, shape index: {}]   ;;  %s232_s2 = inlined_call_operand.vmem [shape: f32[16,128], index: 2, kind: output, shape index: {}]  }
   0x1   :  { %149 = vmatprep.subr.bf16.mxu0 %v180_v0  ;;  %v171_v1 = vld [vmem:[%s230_s1 + $0x38] sm:$0xff]   ;;  %165 = vmatprep.mubr.msk.bf16.mxu0 %vm181_vm0, %v180_v0  ;;  %v172_v2 = vld [vmem:[%s230_s1 + $0x30] sm:$0xff]   ;;  %v173_v3 = vld [vmem:[%s230_s1 + $0x28] sm:$0xff]  }
   0x2   :  { %150 = vmatpush3.bf16.msra.mxu0 %v171_v1  ;;  %v174_v4 = vld [vmem:[%s230_s1 + $0x20] sm:$0xff]   ;;  %v175_v5 = vld [vmem:[%s230_s1 + $0x18] sm:$0xff]   ;;  %v176_v6 = vld [vmem:[%s230_s1 + $0x10] sm:$0xff]  }
   0x3   :  { %151 = vmatprep.subr.bf16.mxu0 %v180_v0  ;;  %v177_v7 = vld [vmem:[%s230_s1 + $0x8] sm:$0xff]   ;;  %v178_v8 = vld [vmem:[%s230_s1] sm:$0xff]  }
   0x4   :  { %v179_v9 = vld [vmem:[%s231_s0] sm:$0xff]  }
   0x6   :  { %152 = vmatpush3.bf16.msra.mxu0 %v172_v2 }
   0x7   :  { %153 = vmatprep.subr.bf16.mxu0 %v180_v0 }
   0xa   :  { %154 = vmatpush3.bf16.msra.mxu0 %v173_v3 }
   0xb   :  { %155 = vmatprep.subr.bf16.mxu0 %v180_v0 }
   0xe   :  { %156 = vmatpush3.bf16.msra.mxu0 %v174_v4 }
   0xf   :  { %157 = vmatprep.subr.bf16.mxu0 %v180_v0 }
  0x12   :  { %158 = vmatpush3.bf16.msra.mxu0 %v175_v5 }
  0x13   :  { %159 = vmatprep.subr.bf16.mxu0 %v180_v0 }
  0x16   :  { %160 = vmatpush3.bf16.msra.mxu0 %v176_v6 }
  0x17   :  { %161 = vmatprep.subr.bf16.mxu0 %v180_v0 }
  0x1a   :  { %162 = vmatpush3.bf16.msra.mxu0 %v177_v7 }
  0x1b   :  { %163 = vmatprep.subr.bf16.mxu0 %v180_v0 }
  0x1e   :  { %164 = vmatpush3.bf16.msra.mxu0 %v178_v8 }
  0x21   :  { %166 = vmatmul.mubr.bf16.vlgmr.msra.gmra.mxu0 %v179_v9 }
  0xe1   :  { %v118_v10 = vpop.f32.mrf.mxu0 }
  0xe2   :  { %125 = vst [vmem:[%s232_s2] sm:$0xff] %v118_v10 }
  0xe3   :  { %v167_v11 = vpop.f32.mrf.mxu0 }
  0xe5   :  { %v121_v12 = vpop.f32.mrf.mxu0 }
  0xe6   :  { %126 = vst [vmem:[%s232_s2 + $0x8] sm:$0xff] %v121_v12 }
  0xe7   :  { %v168_v13 = vpop.f32.mrf.mxu0 }

// kernel: gpt_head_forward.23
= control target key start
LH: loop header
LB: loop body
LE: loop exit
PB: predicated region body
PF: predicated region fallthrough
CT: control target
= control target key end

     0   :  { %s848_s1 = inlined_call_operand.vmem [shape: bf16[512,128], index: 1, kind: input, shape index: {}]   ;;  %s849_s0 = inlined_call_operand.vmem [shape: bf16[48,512], index: 0, kind: input, shape index: {}]   ;;  %s850_s2 = inlined_call_operand.vmem [shape: f32[1,128], index: 2, kind: input, shape index: {}]   ;;  %s851_s3 = inlined_call_operand.vmem [shape: f32[48,128], index: 3, kind: input, shape index: {}]   ;;  %s852_s4 = inlined_call_operand.vmem [shape: f32[48,128], index: 4, kind: output, shape index: {}]  }
   0x1   :  { %v602_v0 = vld [vmem:[%s848_s1 + $0x78] sm:$0xff]   ;;  %v606_v4 = vld [vmem:[%s848_s1 + $0x70] sm:$0xff]   ;;  %v610_v8 = vld [vmem:[%s848_s1 + $0x68] sm:$0xff]  }
   0x2   :  { %v603_v1 = vld [vmem:[%s848_s1 + $0xf8] sm:$0xff]   ;;  %534 = vmatprep.subr.bf16.mxu0 %v602_v0  ;;  %v607_v5 = vld [vmem:[%s848_s1 + $0xf0] sm:$0xff]   ;;  %v611_v9 = vld [vmem:[%s848_s1 + $0xe8] sm:$0xff]  }
   0x3   :  { %v604_v2 = vld [vmem:[%s848_s1 + $0x38] sm:$0xff]   ;;  %568 = vmatprep.subr.bf16.mxu1 %v603_v1  ;;  %v608_v6 = vld [vmem:[%s848_s1 + $0x30] sm:$0xff]   ;;  %v612_v10 = vld [vmem:[%s848_s1 + $0x28] sm:$0xff]  }
   0x4   :  { %v605_v3 = vld [vmem:[%s848_s1 + $0xb8] sm:$0xff]   ;;  %535 = vmatpush3.bf16.msra.mxu0 %v604_v2  ;;  %v609_v7 = vld [vmem:[%s848_s1 + $0xb0] sm:$0xff]   ;;  %v613_v11 = vld [vmem:[%s848_s1 + $0xa8] sm:$0xff]  }
   0x5   :  { %569 = vmatpush3.bf16.msra.mxu1 %v605_v3  ;;  %536 = vmatprep.subr.bf16.mxu0 %v606_v4  ;;  %v614_v12 = vld [vmem:[%s848_s1 + $0x60] sm:$0xff]   ;;  %v618_v16 = vld [vmem:[%s848_s1 + $0x58] sm:$0xff]   ;;  %v622_v20 = vld [vmem:[%s848_s1 + $0x50] sm:$0xff]  }
   0x6   :  { %570 = vmatprep.subr.bf16.mxu1 %v607_v5  ;;  %v615_v13 = vld [vmem:[%s848_s1 + $0xe0] sm:$0xff]   ;;  %v619_v17 = vld [vmem:[%s848_s1 + $0xd8] sm:$0xff]   ;;  %v623_v21 = vld [vmem:[%s848_s1 + $0xd0] sm:$0xff]  }
   0x7   :  { %v616_v14 = vld [vmem:[%s848_s1 + $0x20] sm:$0xff]   ;;  %v620_v18 = vld [vmem:[%s848_s1 + $0x18] sm:$0xff]   ;;  %v624_v22 = vld [vmem:[%s848_s1 + $0x10] sm:$0xff]  }
   0x8   :  { %537 = vmatpush3.bf16.msra.mxu0 %v608_v6  ;;  %v617_v15 = vld [vmem:[%s848_s1 + $0xa0] sm:$0xff]   ;;  %v621_v19 = vld [vmem:[%s848_s1 + $0x98] sm:$0xff]   ;;  %v625_v23 = vld [vmem:[%s848_s1 + $0x90] sm:$0xff]  }
   0x9   :  { %571 = vmatpush3.bf16.msra.mxu1 %v609_v7  ;;  %538 = vmatprep.subr.bf16.mxu0 %v610_v8  ;;  %v626_v24 = vld [vmem:[%s848_s1 + $0x48] sm:$0xff]   ;;  %v630_v28 = vld [vmem:[%s848_s1 + $0x40] sm:$0xff]  }
   0xa   :  { %572 = vmatprep.subr.bf16.mxu1 %v611_v9  ;;  %v627_v25 = vld [vmem:[%s848_s1 + $0xc8] sm:$0xff]   ;;  %v631_v29 = vld [vmem:[%s848_s1 + $0xc0] sm:$0xff]  }
   0xb   :  { %v628_v26 = vld [vmem:[%s848_s1 + $0x8] sm:$0xff]   ;;  %v632_v30 = vld [vmem:[%s848_s1] sm:$0xff]  }
   0xc   :  { %539 = vmatpush3.bf16.msra.mxu0 %v612_v10  ;;  %v629_v27 = vld [vmem:[%s848_s1 + $0x88] sm:$0xff]   ;;  %v633_v31 = vld [vmem:[%s848_s1 + $0x80] sm:$0xff]   ;;  %v469_v10 = vld [vmem:[%s851_s3 + $0x10] sm:$0xff] }
   0xd   :  { %573 = vmatpush3.bf16.msra.mxu1 %v613_v11  ;;  %540 = vmatprep.subr.bf16.mxu0 %v614_v12  ;;  %v634_v32 = vld [vmem:[%s849_s0] ss:$16 sps:$4 sm:$0xff]   ;;  %v636_v33 = vld [vmem:[%s849_s0 + $0x4] ss:$16 sps:$4 sm:$0xff]   ;;  %v637_v34 = vld [vmem:[%s849_s0 + $0x8] ss:$16 sps:$4 sm:$0xff]  }
   0xe   :  { %574 = vmatprep.subr.bf16.mxu1 %v615_v13  ;;  %v639_v35 = vld [vmem:[%s849_s0 + $0xc] ss:$16 sps:$4 sm:$0xff]   ;;  %385 = vmatprep.mubr.bf16.mxu0 %v636_v33  ;;  %v640_v36 = vld [vmem:[%s849_s0 + $0x24] ss:$16 sps:$4 sm:$0xff]   ;;  %v644_v38 = vld [vmem:[%s849_s0 + $0x20] ss:$16 sps:$4 sm:$0xff]  }
   0xf   :  { %442 = vmatprep.mubr.bf16.mxu1 %v639_v35  ;;  %v642_v37 = vld [vmem:[%s849_s0 + $0x2c] ss:$16 sps:$4 sm:$0xff]   ;;  %v645_v39 = vld [vmem:[%s849_s0 + $0x28] ss:$16 sps:$4 sm:$0xff]   ;;  %v646_v40 = vld [vmem:[%s849_s0 + $0x44] ss:$16 sps:$4 sm:$0xff]  }
  0x10   :  { %541 = vmatpush3.bf16.msra.mxu0 %v616_v14  ;;  %v648_v41 = vld [vmem:[%s849_s0 + $0x4c] ss:$16 sps:$4 sm:$0xff]   ;;  %v650_v42 = vld [vmem:[%s849_s0 + $0x40] ss:$16 sps:$4 sm:$0xff]   ;;  %v651_v43 = vld [vmem:[%s849_s0 + $0x48] ss:$16 sps:$4 sm:$0xff]  }
  0x11   :  { %575 = vmatpush3.bf16.msra.mxu1 %v617_v15  ;;  %542 = vmatprep.subr.bf16.mxu0 %v618_v16  ;;  %v489_v46 = vld [vmem:[%s850_s2] ss:$0 sm:$0xff]  ;;  %v468_v0 = vld [vmem:[%s851_s3 + $0x8] sm:$0xff] }
  0x12   :  { %576 = vmatprep.subr.bf16.mxu1 %v619_v17  ;;  %v467_v54 = vld [vmem:[%s851_s3] sm:$0xff] }
  0x14   :  { %543 = vmatpush3.bf16.msra.mxu0 %v620_v18 }
  0x15   :  { %577 = vmatpush3.bf16.msra.mxu1 %v621_v19  ;;  %544 = vmatprep.subr.bf16.mxu0 %v622_v20  ;;  %v470_v20 = vld [vmem:[%s851_s3 + $0x18] sm:$0xff] }
  0x16   :  { %578 = vmatprep.subr.bf16.mxu1 %v623_v21 }
  0x18   :  { %545 = vmatpush3.bf16.msra.mxu0 %v624_v22 }
  0x19   :  { %579 = vmatpush3.bf16.msra.mxu1 %v625_v23  ;;  %546 = vmatprep.subr.bf16.mxu0 %v626_v24 }
  0x1a   :  { %580 = vmatprep.subr.bf16.mxu1 %v627_v25 }
  0x1c   :  { %547 = vmatpush3.bf16.msra.mxu0 %v628_v26 }
  0x1d   :  { %581 = vmatpush3.bf16.msra.mxu1 %v629_v27  ;;  %548 = vmatprep.subr.bf16.mxu0 %v630_v28 }
  0x1e   :  { %582 = vmatprep.subr.bf16.mxu1 %v631_v29 }
  0x20   :  { %549 = vmatpush3.bf16.msra.mxu0 %v632_v30  ;;  %v471_v30 = vld [vmem:[%s851_s3 + $0x20] sm:$0xff] }
  0x21   :  { %583 = vmatpush3.bf16.msra.mxu1 %v633_v31 }
  0x23   :  { %386 = vmatmul.mubr.bf16.vlgmr.msra.gmra.mxu0 %v634_v32 }
  0x24   :  { %443 = vmatmul.mubr.bf16.vlgmr.msra.gmra.mxu1 %v637_v34  ;;  %393 = vmatprep.mubr.bf16.mxu0 %v640_v36 }
  0x25   :  { %450 = vmatprep.mubr.bf16.mxu1 %v642_v37 }
  0x2b   :  { %394 = vmatmul.mubr.bf16.gmra.mxu0 %v644_v38  ;;  %v472_v38 = vld [vmem:[%s851_s3 + $0x28] sm:$0xff] }
  0x2c   :  { %451 = vmatmul.mubr.bf16.gmra.mxu1 %v645_v39  ;;  %401 = vmatprep.mubr.bf16.mxu0 %v646_v40 }
  0x2d   :  { %458 = vmatprep.mubr.bf16.mxu1 %v648_v41 }
  0x33   :  { %402 = vmatmul.mubr.bf16.gmra.mxu0 %v650_v42 }
  0x34   :  { %459 = vmatmul.mubr.bf16.gmra.mxu1 %v651_v43 }
  0xe3   :  { %v550_v44 = vpop.f32.mrf.mxu0 }
  0xe4   :  { %v584_v45 = vpop.f32.mrf.mxu1 }
  0xe5   :  { %v551_v47 = vpop.f32.mrf.mxu0 }
  0xe6   :  { %v552_v48 = vadd.f32 %v551_v47, %v550_v44  ;;  %v585_v49 = vpop.f32.mrf.mxu1 }
  0xe7   :  { %v553_v50 = vpop.f32.mrf.mxu0  ;;  %v586_v52 = vadd.f32 %v585_v49, %v584_v45 }
  0xe8   :  { %v388_v51 = vadd.f32 %v552_v48, %v489_v46  ;;  %v587_v53 = vpop.f32.mrf.mxu1 }
  0xe9   :  { %v554_v55 = vpop.f32.mrf.mxu0 }
  0xea   :  { %v445_v56 = vadd.f32 %v586_v52, %v388_v51  ;;  %v555_v57 = vadd.f32 %v554_v55, %v553_v50  ;;  %v588_v58 = vpop.f32.mrf.mxu1 }
  0xeb   :  { %v556_v59 = vpop.f32.mrf.mxu0  ;;  %v589_v62 = vadd.f32 %v588_v58, %v587_v53 }
  0xec   :  { %v473_v60 = vadd.f32 %v467_v54, %v445_v56  ;;  %v391_v61 = vadd.f32 %v555_v57, %v489_v46  ;;  %v590_v63 = vpop.f32.mrf.mxu1 }
  0xed   :  { %v557_v1 = vpop.f32.mrf.mxu0 }
  0xee   :  { %479 = vst [vmem:[%s852_s4] sm:$0xff] %v473_v60  ;;  %v448_v2 = vadd.f32 %v589_v62, %v391_v61  ;;  %v558_v3 = vadd.f32 %v557_v1, %v556_v59  ;;  %v591_v4 = vpop.f32.mrf.mxu1 }
  0xef   :  { %v559_v5 = vpop.f32.mrf.mxu0  ;;  %v592_v8 = vadd.f32 %v591_v4, %v590_v63 }
  0xf0   :  { %v474_v6 = vadd.f32 %v468_v0, %v448_v2  ;;  %v396_v7 = vadd.f32 %v558_v3, %v489_v46  ;;  %v593_v9 = vpop.f32.mrf.mxu1 }
  0xf1   :  { %v560_v11 = vpop.f32.mrf.mxu0 }
  0xf2   :  { %480 = vst [vmem:[%s852_s4 + $0x8] sm:$0xff] %v474_v6  ;;  %v453_v12 = vadd.f32 %v592_v8, %v396_v7  ;;  %v561_v13 = vadd.f32 %v560_v11, %v559_v5  ;;  %v594_v14 = vpop.f32.mrf.mxu1 }
  0xf3   :  { %v562_v15 = vpop.f32.mrf.mxu0  ;;  %v595_v18 = vadd.f32 %v594_v14, %v593_v9 }
  0xf4   :  { %v475_v16 = vadd.f32 %v469_v10, %v453_v12  ;;  %v399_v17 = vadd.f32 %v561_v13, %v489_v46  ;;  %v596_v19 = vpop.f32.mrf.mxu1 }
  0xf5   :  { %v563_v21 = vpop.f32.mrf.mxu0 }
  0xf6   :  { %481 = vst [vmem:[%s852_s4 + $0x10] sm:$0xff] %v475_v16  ;;  %v456_v22 = vadd.f32 %v595_v18, %v399_v17  ;;  %v564_v23 = vadd.f32 %v563_v21, %v562_v15  ;;  %v597_v24 = vpop.f32.mrf.mxu1 }
  0xf7   :  { %v565_v25 = vpop.f32.mrf.mxu0  ;;  %v598_v28 = vadd.f32 %v597_v24, %v596_v19 }
  0xf8   :  { %v476_v26 = vadd.f32 %v470_v20, %v456_v22  ;;  %v404_v27 = vadd.f32 %v564_v23, %v489_v46  ;;  %v599_v29 = vpop.f32.mrf.mxu1 }
  0xf9   :  { %v566_v31 = vpop.f32.mrf.mxu0 }
  0xfa   :  { %482 = vst [vmem:[%s852_s4 + $0x18] sm:$0xff] %v476_v26  ;;  %v461_v32 = vadd.f32 %v598_v28, %v404_v27  ;;  %v567_v33 = vadd.f32 %v566_v31, %v565_v25  ;;  %v600_v34 = vpop.f32.mrf.mxu1 }
  0xfb   :  { %v601_v37 = vadd.f32 %v600_v34, %v599_v29 }
  0xfc   :  { %v477_v35 = vadd.f32 %v471_v30, %v461_v32  ;;  %v407_v36 = vadd.f32 %v567_v33, %v489_v46 }
  0xfe   :  { %483 = vst [vmem:[%s852_s4 + $0x20] sm:$0xff] %v477_v35  ;;  %v464_v39 = vadd.f32 %v601_v37, %v407_v36 }
 0x100   :  { %v478_v40 = vadd.f32 %v472_v38, %v464_v39 }
 0x102   :  { %484 = vst [vmem:[%s852_s4 + $0x28] sm:$0xff] %v478_v40 }

</bundles_post_ra>
